<compile_context>
chip_gen: v6e
topology: v6e:2x2x1
jax: 0.10.0
libtpu: 0.0.40
codegen_flags: <defaults>
</compile_context>

<pallas_src>
import functools
import math

import jax
import jax.numpy as jnp
from jax.experimental import pallas as pl
from jax.experimental.pallas import tpu as pltpu


VMEM_LIMIT = 32 * 1024 * 1024   # bytes; portable across v5e/v6e/v7x


# ------------------------------ tiling helper ------------------------------

def _pick_tile(dim, target, align=16):
    """Largest divisor of `dim` that is <= target and a multiple of `align`.
    Never silently falls back to a huge full-extent block."""
    if dim <= target:
        return dim
    t = (target // align) * align
    while t >= align:
        if dim % t == 0:
            return t
        t -= align
    # TODO(synk): non-factorable dims would need a cdiv grid + masked epilogue.
    raise ValueError(f"cannot tile dim={dim} (target={target}, align={align})")


# ------------------------------ Pallas kernels ------------------------------

def _linear_kernel(x_ref, w_ref, b_ref, o_ref, *, act):
    """M-tiled matmul, weight VMEM-resident, bf16 operands, f32 accumulation,
    fused bias + activation epilogue."""
    acc = jnp.dot(x_ref[...], w_ref[...], preferred_element_type=jnp.float32)
    acc = acc + b_ref[...]
    if act == "gelu":
        # exact erf form (PyTorch nn.GELU default)
        acc = 0.5 * acc * (1.0 + jax.lax.erf(acc * (1.0 / math.sqrt(2.0))))
    elif act == "tanh":
        acc = jnp.tanh(acc)
    o_ref[...] = acc.astype(o_ref.dtype)


def linear(x, w, b, act="none", out_dtype=jnp.bfloat16, tm_target=256):
    M, K = x.shape
    N = w.shape[1]
    tm = _pick_tile(M, tm_target, 16)
    grid = (M // tm,)
    cost = pl.CostEstimate(
        flops=2 * M * K * N,
        transcendentals=(M * N if act in ("gelu", "tanh") else 0),
        bytes_accessed=M * K * x.dtype.itemsize + K * N * w.dtype.itemsize
        + M * N * jnp.dtype(out_dtype).itemsize + N * 4)
    return pl.pallas_call(
        functools.partial(_linear_kernel, act=act),
        grid=grid,
        in_specs=[pl.BlockSpec((tm, K), lambda i: (i, 0)),
                  pl.BlockSpec((K, N), lambda i: (0, 0)),    # resident weight
                  pl.BlockSpec((1, N), lambda i: (0, 0))],
        out_specs=pl.BlockSpec((tm, N), lambda i: (i, 0)),
        out_shape=jax.ShapeDtypeStruct((M, N), out_dtype),
        compiler_params=pltpu.CompilerParams(
            dimension_semantics=("parallel",),
            vmem_limit_bytes=VMEM_LIMIT),
        cost_estimate=cost,
    )(x, w, b.reshape(1, N))


def _linear_res_ln_kernel(x_ref, w_ref, b_ref, res_ref, g_ref, beta_ref,
                          o_ref, *, eps):
    """M-tiled matmul (resident weight) with fused bias + residual + LN."""
    h = jnp.dot(x_ref[...], w_ref[...], preferred_element_type=jnp.float32)
    h = h + b_ref[...] + res_ref[...].astype(jnp.float32)
    mean = jnp.mean(h, axis=-1, keepdims=True)
    var = jnp.mean(jnp.square(h - mean), axis=-1, keepdims=True)
    y = (h - mean) * jax.lax.rsqrt(var + eps)
    o_ref[...] = (y * g_ref[...] + beta_ref[...]).astype(o_ref.dtype)


def linear_res_ln(x, w, b, res, g, beta, eps=1e-12, out_dtype=jnp.bfloat16,
                  tm_target=256):
    M, K = x.shape
    N = w.shape[1]                       # N (=hidden) whole for the LN reduce
    tm = _pick_tile(M, tm_target, 16)
    grid = (M // tm,)
    cost = pl.CostEstimate(
        flops=2 * M * K * N + 8 * M * N,
        transcendentals=M,                                  # rsqrt per row
        bytes_accessed=M * K * x.dtype.itemsize + K * N * w.dtype.itemsize
        + M * N * res.dtype.itemsize
        + M * N * jnp.dtype(out_dtype).itemsize + 3 * N * 4)
    return pl.pallas_call(
        functools.partial(_linear_res_ln_kernel, eps=eps),
        grid=grid,
        in_specs=[pl.BlockSpec((tm, K), lambda i: (i, 0)),
                  pl.BlockSpec((K, N), lambda i: (0, 0)),   # resident weight
                  pl.BlockSpec((1, N), lambda i: (0, 0)),
                  pl.BlockSpec((tm, N), lambda i: (i, 0)),
                  pl.BlockSpec((1, N), lambda i: (0, 0)),
                  pl.BlockSpec((1, N), lambda i: (0, 0))],
        out_specs=pl.BlockSpec((tm, N), lambda i: (i, 0)),
        out_shape=jax.ShapeDtypeStruct((M, N), out_dtype),
        compiler_params=pltpu.CompilerParams(
            dimension_semantics=("parallel",),
            vmem_limit_bytes=VMEM_LIMIT),
        cost_estimate=cost,
    )(x, w, b.reshape(1, N), res, g.reshape(1, N), beta.reshape(1, N))


def _layernorm_kernel(x_ref, g_ref, b_ref, o_ref, *, eps):
    x = x_ref[...].astype(jnp.float32)
    mean = jnp.mean(x, axis=-1, keepdims=True)
    var = jnp.mean(jnp.square(x - mean), axis=-1, keepdims=True)
    y = (x - mean) * jax.lax.rsqrt(var + eps)
    o_ref[...] = (y * g_ref[...] + b_ref[...]).astype(o_ref.dtype)


def layernorm(x, g, b, eps=1e-12, out_dtype=jnp.bfloat16, tm_target=512):
    M, H = x.shape
    tm = _pick_tile(M, tm_target, 16)
    return pl.pallas_call(
        functools.partial(_layernorm_kernel, eps=eps),
        grid=(M // tm,),
        in_specs=[pl.BlockSpec((tm, H), lambda i: (i, 0)),
                  pl.BlockSpec((1, H), lambda i: (0, 0)),
                  pl.BlockSpec((1, H), lambda i: (0, 0))],
        out_specs=pl.BlockSpec((tm, H), lambda i: (i, 0)),
        out_shape=jax.ShapeDtypeStruct((M, H), out_dtype),
        compiler_params=pltpu.CompilerParams(
            dimension_semantics=("parallel",),
            vmem_limit_bytes=VMEM_LIMIT),
    )(x, g.reshape(1, H), b.reshape(1, H))


def _attention_kernel(q_ref, k_ref, v_ref, bias_ref, o_ref,
                      *, nh, dh, k_off, v_off):
    """All heads for one (batch, q-tile): per-head scores against the full
    sequence (K/V block is VMEM-resident per batch), softmax in f32, output
    written as one lane-dense (tq, H) block.  The 1/sqrt(dh) scale is already
    folded into Q (via wqkv), the attention mask arrives as an additive bias."""
    bias = bias_ref[...]                                    # (1, S) f32
    outs = []
    for h in range(nh):                                     # static head loop
        q = q_ref[:, h * dh:(h + 1) * dh]                   # (tq, dh) bf16
        k = k_ref[:, k_off + h * dh:k_off + (h + 1) * dh]   # (S, dh) bf16
        v = v_ref[:, v_off + h * dh:v_off + (h + 1) * dh]   # (S, dh) bf16
        s = jax.lax.dot_general(q, k, (((1,), (1,)), ((), ())),
                                preferred_element_type=jnp.float32)  # (tq, S)
        s = s + bias
        m = jnp.max(s, axis=-1, keepdims=True)
        e = jnp.exp(s - m)
        inv = pl.reciprocal(jnp.sum(e, axis=-1, keepdims=True), approx=True)
        p = (e * inv).astype(v.dtype)
        outs.append(jnp.dot(p, v, preferred_element_type=jnp.float32))
    o_ref[...] = jnp.concatenate(outs, axis=-1).astype(o_ref.dtype)


def attention(qkv, mask_bias, B, S, nh, dh, out_dtype=jnp.bfloat16,
              tq_target=128):
    """qkv: (B*S, 3H) fused projection (Q pre-scaled). mask_bias: (B, 1, S).
    Returns the attention context in (B*S, H) layout (no HBM transposes)."""
    M, threeH = qkv.shape
    H = nh * dh
    tq = _pick_tile(S, tq_target, 16)
    n_q = S // tq
    split = (H % 128 == 0)            # read Q/K/V thirds as separate H-wide blocks
    W = H if split else threeH
    q_spec = pl.BlockSpec((tq, W), lambda b, qi: (b * n_q + qi, 0))
    if split:
        k_spec = pl.BlockSpec((S, W), lambda b, qi: (b, 1))
        v_spec = pl.BlockSpec((S, W), lambda b, qi: (b, 2))
        k_off, v_off = 0, 0
    else:
        k_spec = pl.BlockSpec((S, W), lambda b, qi: (b, 0))
        v_spec = pl.BlockSpec((S, W), lambda b, qi: (b, 0))
        k_off, v_off = H, 2 * H
    bias_spec = pl.BlockSpec((None, 1, S), lambda b, qi: (b, 0, 0))

    cost = pl.CostEstimate(
        flops=4 * B * nh * S * S * dh,
        transcendentals=B * nh * S * S,
        bytes_accessed=2 * M * threeH * qkv.dtype.itemsize
        + B * S * 4 + M * H * jnp.dtype(out_dtype).itemsize)

    return pl.pallas_call(
        functools.partial(_attention_kernel, nh=nh, dh=dh,
                          k_off=k_off, v_off=v_off),
        grid=(B, n_q),
        in_specs=[q_spec, k_spec, v_spec, bias_spec],
        out_specs=pl.BlockSpec((tq, H), lambda b, qi: (b * n_q + qi, 0)),
        out_shape=jax.ShapeDtypeStruct((M, H), out_dtype),
        compiler_params=pltpu.CompilerParams(
            dimension_semantics=("parallel", "parallel"),
            vmem_limit_bytes=VMEM_LIMIT),
        cost_estimate=cost,
    )(qkv, qkv, qkv, mask_bias)


def _head_kernel(cls_ref, pw_ref, pb_ref, fw_ref, fb_ref, lab_ref,
                 loss_ref, logits_ref, probs_ref):
    """Fused BERT pooler (tanh) + classifier + CrossEntropyLoss + softmax."""
    pooled = jnp.tanh(
        jnp.dot(cls_ref[...], pw_ref[...], preferred_element_type=jnp.float32)
        + pb_ref[...])
    logits = jnp.dot(pooled.astype(fw_ref.dtype), fw_ref[...],
                     preferred_element_type=jnp.float32) + fb_ref[...]
    logits_ref[...] = logits

    B, C = logits.shape
    m = jnp.max(logits, axis=-1, keepdims=True)
    e = jnp.exp(logits - m)
    denom = jnp.sum(e, axis=-1, keepdims=True)
    probs_ref[...] = e / denom                          # exact softmax output
    lse = jnp.log(denom) + m                            # (B,1)
    col = jax.lax.broadcasted_iota(jnp.int32, (B, C), 1)
    onehot = (col == lab_ref[...]).astype(jnp.float32)
    tgt = jnp.sum(logits * onehot, axis=-1, keepdims=True)
    loss_ref[...] = (jnp.sum(lse - tgt) / B).reshape(1, 1)


def cls_head(cls_tok, pool_w, pool_b, fc_w, fc_b, labels):
    B, H = cls_tok.shape
    C = fc_w.shape[1]
    # TODO(synk): labels could live in SMEM and C could be padded to 128 for a
    # lane-dense logits store; head is tiny so kept as simple VMEM blocks.
    loss, logits, probs = pl.pallas_call(
        _head_kernel,
        grid=(1,),
        in_specs=[pl.BlockSpec((B, H), lambda i: (0, 0)),
                  pl.BlockSpec((H, H), lambda i: (0, 0)),
                  pl.BlockSpec((1, H), lambda i: (0, 0)),
                  pl.BlockSpec((H, C), lambda i: (0, 0)),
                  pl.BlockSpec((1, C), lambda i: (0, 0)),
                  pl.BlockSpec((B, 1), lambda i: (0, 0))],
        out_specs=[pl.BlockSpec((1, 1), lambda i: (0, 0)),
                   pl.BlockSpec((B, C), lambda i: (0, 0)),
                   pl.BlockSpec((B, C), lambda i: (0, 0))],
        out_shape=[jax.ShapeDtypeStruct((1, 1), jnp.float32),
                   jax.ShapeDtypeStruct((B, C), jnp.float32),
                   jax.ShapeDtypeStruct((B, C), jnp.float32)],
    )(cls_tok, pool_w, pool_b.reshape(1, H), fc_w, fc_b.reshape(1, C),
      labels.reshape(B, 1).astype(jnp.int32))
    return loss[0, 0], logits, probs


# ------------------------- parameters (deterministic) -----------------------

def init_params(key, cfg):
    # TODO(synk): pretrained 'bert-base-chinese' weights are not loadable here;
    # random-initialized weights with the same architecture are used instead.
    H = cfg["hidden"]
    I = cfg["intermediate"]
    dh = H // cfg["heads"]
    q_scale = 1.0 / math.sqrt(dh)       # fold 1/sqrt(dh) into the Q projection

    def nrm(k, shape):
        return jax.random.normal(k, shape, jnp.float32) * 0.02

    keys = iter(jax.random.split(key, 256))
    p = {
        "word_emb": nrm(next(keys), (cfg["vocab"], H)),
        "pos_emb": nrm(next(keys), (cfg["max_pos"], H)),
        "type_emb": nrm(next(keys), (cfg["type_vocab"], H)),
        "emb_ln_g": jnp.ones((H,), jnp.float32),
        "emb_ln_b": jnp.zeros((H,), jnp.float32),
        "layers": [],
    }
    for _ in range(cfg["layers"]):
        wq = nrm(next(keys), (H, H)) * q_scale
        wk = nrm(next(keys), (H, H))
        wv = nrm(next(keys), (H, H))
        bq = jnp.zeros((H,), jnp.float32) * q_scale
        p["layers"].append({
            # fused QKV weight (Q columns pre-scaled), bf16 for the MXU
            "wqkv": jnp.concatenate([wq, wk, wv], axis=1).astype(jnp.bfloat16),
            "bqkv": jnp.concatenate(
                [bq, jnp.zeros((H,), jnp.float32), jnp.zeros((H,), jnp.float32)]),
            "wo": nrm(next(keys), (H, H)).astype(jnp.bfloat16),
            "bo": jnp.zeros((H,), jnp.float32),
            "ln1_g": jnp.ones((H,), jnp.float32), "ln1_b": jnp.zeros((H,), jnp.float32),
            "wi": nrm(next(keys), (H, I)).astype(jnp.bfloat16),
            "bi": jnp.zeros((I,), jnp.float32),
            "wo2": nrm(next(keys), (I, H)).astype(jnp.bfloat16),
            "bo2": jnp.zeros((H,), jnp.float32),
            "ln2_g": jnp.ones((H,), jnp.float32), "ln2_b": jnp.zeros((H,), jnp.float32),
        })
    p["pool_w"] = nrm(next(keys), (H, H)).astype(jnp.bfloat16)
    p["pool_b"] = jnp.zeros((H,), jnp.float32)
    p["fc_w"] = nrm(next(keys), (H, cfg["num_classes"])).astype(jnp.bfloat16)
    p["fc_b"] = jnp.zeros((cfg["num_classes"],), jnp.float32)
    return p


# --------------------------------- forward ----------------------------------

def bert_model_forward(params, cfg, batch_seqs, batch_seq_masks,
                       batch_seq_segments, labels):
    B, S = batch_seqs.shape
    H = cfg["hidden"]
    nh = cfg["heads"]
    dh = H // nh
    M = B * S

    # embeddings (gather glue) + layernorm kernel -> bf16 activation stream
    we = jnp.take(params["word_emb"], batch_seqs, axis=0)          # (B,S,H)
    pe = params["pos_emb"][:S][None, :, :]                          # (1,S,H)
    te = jnp.take(params["type_emb"], batch_seq_segments, axis=0)   # (B,S,H)
    x = (we + pe + te).reshape(M, H)
    x = layernorm(x, params["emb_ln_g"], params["emb_ln_b"])        # (M,H) bf16
    # TODO(synk): residual stream is carried in bf16 (vs fp32 PyTorch); no dropout.

    # additive attention mask bias, BERT-style: (1 - mask) * -10000, (B,1,S) f32
    maskf = batch_seq_masks.astype(jnp.float32)
    mask_bias = ((1.0 - maskf) * -10000.0)[:, None, :]

    for l in params["layers"]:
        # fused QKV projection: one matmul, weight resident, Q pre-scaled
        qkv = linear(x, l["wqkv"], l["bqkv"])                       # (M, 3H) bf16
        # attention straight from the (M,3H) buffer into an (M,H) buffer
        ctx = attention(qkv, mask_bias, B, S, nh, dh)               # (M, H) bf16
        # out-projection + residual + layernorm (fused)
        x = linear_res_ln(ctx, l["wo"], l["bo"], x, l["ln1_g"], l["ln1_b"])
        # FFN up-projection + exact GELU (fused)
        inter = linear(x, l["wi"], l["bi"], act="gelu")             # (M, I) bf16
        # FFN down-projection + residual + layernorm (fused)
        x = linear_res_ln(inter, l["wo2"], l["bo2"], x, l["ln2_g"], l["ln2_b"])

    # BERT pooler (tanh on [CLS]) + classifier + CE loss + softmax, one kernel
    cls_tok = x.reshape(B, S, H)[:, 0, :]                           # (B,H) bf16
    loss, logits, probabilities = cls_head(
        cls_tok, params["pool_w"], params["pool_b"],
        params["fc_w"], params["fc_b"], labels)
    return loss, logits, probabilities


# ----------------------------------- main ------------------------------------

if __name__ == "__main__":
    cfg = dict(vocab=128, hidden=32, heads=4, layers=2, intermediate=64,
               max_pos=16, type_vocab=2, num_classes=4)
    key = jax.random.PRNGKey(0)
    pkey, skey, lkey = jax.random.split(key, 3)

    params = init_params(pkey, cfg)

    B, S = 2, 8
    batch_seqs = jax.random.randint(skey, (B, S), 0, cfg["vocab"], dtype=jnp.int32)
    batch_seq_masks = jnp.array([[1, 1, 1, 1, 1, 1, 1, 1],
                                 [1, 1, 1, 1, 1, 0, 0, 0]], dtype=jnp.int32)
    batch_seq_segments = jnp.zeros((B, S), jnp.int32)
    labels = jax.random.randint(lkey, (B,), 0, cfg["num_classes"], dtype=jnp.int32)

    fwd = jax.jit(lambda p, s, m, g, lab: bert_model_forward(p, cfg, s, m, g, lab))
    loss, logits, probabilities = fwd(
        params, batch_seqs, batch_seq_masks, batch_seq_segments, labels)
    jax.block_until_ready((loss, logits, probabilities))
    print("KERNEL_OK")
</pallas_src>

<mosaic_0001>
module attributes {stable_mosaic.version = 11 : i64} {
  func.func @_attention_kernel(%arg0: i32, %arg1: i32, %arg2: memref<8x96xbf16, #tpu.memory_space<vmem>>, %arg3: memref<8x96xbf16, #tpu.memory_space<vmem>>, %arg4: memref<8x96xbf16, #tpu.memory_space<vmem>>, %arg5: memref<1x1x8xf32, #tpu.memory_space<vmem>>, %arg6: memref<8x32xbf16, #tpu.memory_space<vmem>>) attributes {dimension_semantics = [#tpu.dimension_semantics<parallel>, #tpu.dimension_semantics<parallel>], iteration_bounds = array<i64: 2, 1>, scalar_prefetch = 0 : i64, scratch_operands = 0 : i64, tpu.core_type = #tpu.core_type<tc>, window_params = [{transform_indices = @transform_0, window_bounds = array<i64: 8, 96>}, {transform_indices = @transform_1, window_bounds = array<i64: 8, 96>}, {transform_indices = @transform_2, window_bounds = array<i64: 8, 96>}, {transform_indices = @transform_3, window_bounds = array<i64: 1, 1, 8>}, {transform_indices = @transform_4, window_bounds = array<i64: 8, 32>}]} {
    %c0 = arith.constant 0 : index
    %c0_0 = arith.constant 0 : index
    %c0_1 = arith.constant 0 : index
    %0 = vector.load %arg5[%c0, %c0_0, %c0_1] : memref<1x1x8xf32, #tpu.memory_space<vmem>>, vector<1x1x8xf32>
    %1 = vector.shape_cast %0 : vector<1x1x8xf32> to vector<1x8xf32>
    %c0_2 = arith.constant 0 : index
    %c0_3 = arith.constant 0 : index
    %2 = vector.load %arg2[%c0_2, %c0_3] : memref<8x96xbf16, #tpu.memory_space<vmem>>, vector<8x8xbf16>
    %c0_4 = arith.constant 0 : index
    %c32 = arith.constant 32 : index
    %3 = vector.load %arg3[%c0_4, %c32] : memref<8x96xbf16, #tpu.memory_space<vmem>>, vector<8x8xbf16>
    %c0_5 = arith.constant 0 : index
    %c64 = arith.constant 64 : index
    %4 = vector.load %arg4[%c0_5, %c64] : memref<8x96xbf16, #tpu.memory_space<vmem>>, vector<8x8xbf16>
    %cst = arith.constant dense<0.000000e+00> : vector<8x8xf32>
    %5 = tpu.matmul %2, %3, %cst {dimension_numbers = #tpu.dot_dimension_numbers<[1], [1], [0], [0], [0, 0, 1, 0], [], []>} : vector<8x8xbf16>, vector<8x8xbf16>, vector<8x8xf32> -> vector<8x8xf32>
    %6 = vector.broadcast %1 : vector<1x8xf32> to vector<8x8xf32>
    %7 = arith.addf %5, %6 : vector<8x8xf32>
    %cst_6 = arith.constant dense<0xFF800000> : vector<8xf32>
    %8 = vector.multi_reduction <maximumf>, %7, %cst_6 [1] : vector<8x8xf32> to vector<8xf32>
    %9 = vector.shape_cast %8 : vector<8xf32> to vector<8x1xf32>
    %10 = vector.broadcast %9 : vector<8x1xf32> to vector<8x8xf32>
    %11 = arith.subf %7, %10 : vector<8x8xf32>
    %12 = math.exp %11 : vector<8x8xf32>
    %cst_7 = arith.constant dense<0.000000e+00> : vector<8xf32>
    %13 = vector.multi_reduction <add>, %12, %cst_7 [1] : vector<8x8xf32> to vector<8xf32>
    %14 = vector.shape_cast %13 : vector<8xf32> to vector<8x1xf32>
    %15 = tpu.reciprocal %14 {approx = true} : vector<8x1xf32> -> vector<8x1xf32>
    %16 = vector.broadcast %15 : vector<8x1xf32> to vector<8x8xf32>
    %17 = arith.mulf %12, %16 : vector<8x8xf32>
    %18 = arith.truncf %17 : vector<8x8xf32> to vector<8x8xbf16>
    %cst_8 = arith.constant dense<0.000000e+00> : vector<8x8xf32>
    %19 = tpu.matmul %18, %4, %cst_8 {dimension_numbers = #tpu.dot_dimension_numbers<[1], [0], [0], [1], [0, 0, 1, 1], [], []>} : vector<8x8xbf16>, vector<8x8xbf16>, vector<8x8xf32> -> vector<8x8xf32>
    %c0_9 = arith.constant 0 : index
    %c8 = arith.constant 8 : index
    %20 = vector.load %arg2[%c0_9, %c8] : memref<8x96xbf16, #tpu.memory_space<vmem>>, vector<8x8xbf16>
    %c0_10 = arith.constant 0 : index
    %c40 = arith.constant 40 : index
    %21 = vector.load %arg3[%c0_10, %c40] : memref<8x96xbf16, #tpu.memory_space<vmem>>, vector<8x8xbf16>
    %c0_11 = arith.constant 0 : index
    %c72 = arith.constant 72 : index
    %22 = vector.load %arg4[%c0_11, %c72] : memref<8x96xbf16, #tpu.memory_space<vmem>>, vector<8x8xbf16>
    %cst_12 = arith.constant dense<0.000000e+00> : vector<8x8xf32>
    %23 = tpu.matmul %20, %21, %cst_12 {dimension_numbers = #tpu.dot_dimension_numbers<[1], [1], [0], [0], [0, 0, 1, 0], [], []>} : vector<8x8xbf16>, vector<8x8xbf16>, vector<8x8xf32> -> vector<8x8xf32>
    %24 = vector.broadcast %1 : vector<1x8xf32> to vector<8x8xf32>
    %25 = arith.addf %23, %24 : vector<8x8xf32>
    %cst_13 = arith.constant dense<0xFF800000> : vector<8xf32>
    %26 = vector.multi_reduction <maximumf>, %25, %cst_13 [1] : vector<8x8xf32> to vector<8xf32>
    %27 = vector.shape_cast %26 : vector<8xf32> to vector<8x1xf32>
    %28 = vector.broadcast %27 : vector<8x1xf32> to vector<8x8xf32>
    %29 = arith.subf %25, %28 : vector<8x8xf32>
    %30 = math.exp %29 : vector<8x8xf32>
    %cst_14 = arith.constant dense<0.000000e+00> : vector<8xf32>
    %31 = vector.multi_reduction <add>, %30, %cst_14 [1] : vector<8x8xf32> to vector<8xf32>
    %32 = vector.shape_cast %31 : vector<8xf32> to vector<8x1xf32>
    %33 = tpu.reciprocal %32 {approx = true} : vector<8x1xf32> -> vector<8x1xf32>
    %34 = vector.broadcast %33 : vector<8x1xf32> to vector<8x8xf32>
    %35 = arith.mulf %30, %34 : vector<8x8xf32>
    %36 = arith.truncf %35 : vector<8x8xf32> to vector<8x8xbf16>
    %cst_15 = arith.constant dense<0.000000e+00> : vector<8x8xf32>
    %37 = tpu.matmul %36, %22, %cst_15 {dimension_numbers = #tpu.dot_dimension_numbers<[1], [0], [0], [1], [0, 0, 1, 1], [], []>} : vector<8x8xbf16>, vector<8x8xbf16>, vector<8x8xf32> -> vector<8x8xf32>
    %c0_16 = arith.constant 0 : index
    %c16 = arith.constant 16 : index
    %38 = vector.load %arg2[%c0_16, %c16] : memref<8x96xbf16, #tpu.memory_space<vmem>>, vector<8x8xbf16>
    %c0_17 = arith.constant 0 : index
    %c48 = arith.constant 48 : index
    %39 = vector.load %arg3[%c0_17, %c48] : memref<8x96xbf16, #tpu.memory_space<vmem>>, vector<8x8xbf16>
    %c0_18 = arith.constant 0 : index
    %c80 = arith.constant 80 : index
    %40 = vector.load %arg4[%c0_18, %c80] : memref<8x96xbf16, #tpu.memory_space<vmem>>, vector<8x8xbf16>
    %cst_19 = arith.constant dense<0.000000e+00> : vector<8x8xf32>
    %41 = tpu.matmul %38, %39, %cst_19 {dimension_numbers = #tpu.dot_dimension_numbers<[1], [1], [0], [0], [0, 0, 1, 0], [], []>} : vector<8x8xbf16>, vector<8x8xbf16>, vector<8x8xf32> -> vector<8x8xf32>
    %42 = vector.broadcast %1 : vector<1x8xf32> to vector<8x8xf32>
    %43 = arith.addf %41, %42 : vector<8x8xf32>
    %cst_20 = arith.constant dense<0xFF800000> : vector<8xf32>
    %44 = vector.multi_reduction <maximumf>, %43, %cst_20 [1] : vector<8x8xf32> to vector<8xf32>
    %45 = vector.shape_cast %44 : vector<8xf32> to vector<8x1xf32>
    %46 = vector.broadcast %45 : vector<8x1xf32> to vector<8x8xf32>
    %47 = arith.subf %43, %46 : vector<8x8xf32>
    %48 = math.exp %47 : vector<8x8xf32>
    %cst_21 = arith.constant dense<0.000000e+00> : vector<8xf32>
    %49 = vector.multi_reduction <add>, %48, %cst_21 [1] : vector<8x8xf32> to vector<8xf32>
    %50 = vector.shape_cast %49 : vector<8xf32> to vector<8x1xf32>
    %51 = tpu.reciprocal %50 {approx = true} : vector<8x1xf32> -> vector<8x1xf32>
    %52 = vector.broadcast %51 : vector<8x1xf32> to vector<8x8xf32>
    %53 = arith.mulf %48, %52 : vector<8x8xf32>
    %54 = arith.truncf %53 : vector<8x8xf32> to vector<8x8xbf16>
    %cst_22 = arith.constant dense<0.000000e+00> : vector<8x8xf32>
    %55 = tpu.matmul %54, %40, %cst_22 {dimension_numbers = #tpu.dot_dimension_numbers<[1], [0], [0], [1], [0, 0, 1, 1], [], []>} : vector<8x8xbf16>, vector<8x8xbf16>, vector<8x8xf32> -> vector<8x8xf32>
    %c0_23 = arith.constant 0 : index
    %c24 = arith.constant 24 : index
    %56 = vector.load %arg2[%c0_23, %c24] : memref<8x96xbf16, #tpu.memory_space<vmem>>, vector<8x8xbf16>
    %c0_24 = arith.constant 0 : index
    %c56 = arith.constant 56 : index
    %57 = vector.load %arg3[%c0_24, %c56] : memref<8x96xbf16, #tpu.memory_space<vmem>>, vector<8x8xbf16>
    %c0_25 = arith.constant 0 : index
    %c88 = arith.constant 88 : index
    %58 = vector.load %arg4[%c0_25, %c88] : memref<8x96xbf16, #tpu.memory_space<vmem>>, vector<8x8xbf16>
    %cst_26 = arith.constant dense<0.000000e+00> : vector<8x8xf32>
    %59 = tpu.matmul %56, %57, %cst_26 {dimension_numbers = #tpu.dot_dimension_numbers<[1], [1], [0], [0], [0, 0, 1, 0], [], []>} : vector<8x8xbf16>, vector<8x8xbf16>, vector<8x8xf32> -> vector<8x8xf32>
    %60 = vector.broadcast %1 : vector<1x8xf32> to vector<8x8xf32>
    %61 = arith.addf %59, %60 : vector<8x8xf32>
    %cst_27 = arith.constant dense<0xFF800000> : vector<8xf32>
    %62 = vector.multi_reduction <maximumf>, %61, %cst_27 [1] : vector<8x8xf32> to vector<8xf32>
    %63 = vector.shape_cast %62 : vector<8xf32> to vector<8x1xf32>
    %64 = vector.broadcast %63 : vector<8x1xf32> to vector<8x8xf32>
    %65 = arith.subf %61, %64 : vector<8x8xf32>
    %66 = math.exp %65 : vector<8x8xf32>
    %cst_28 = arith.constant dense<0.000000e+00> : vector<8xf32>
    %67 = vector.multi_reduction <add>, %66, %cst_28 [1] : vector<8x8xf32> to vector<8xf32>
    %68 = vector.shape_cast %67 : vector<8xf32> to vector<8x1xf32>
    %69 = tpu.reciprocal %68 {approx = true} : vector<8x1xf32> -> vector<8x1xf32>
    %70 = vector.broadcast %69 : vector<8x1xf32> to vector<8x8xf32>
    %71 = arith.mulf %66, %70 : vector<8x8xf32>
    %72 = arith.truncf %71 : vector<8x8xf32> to vector<8x8xbf16>
    %cst_29 = arith.constant dense<0.000000e+00> : vector<8x8xf32>
    %73 = tpu.matmul %72, %58, %cst_29 {dimension_numbers = #tpu.dot_dimension_numbers<[1], [0], [0], [1], [0, 0, 1, 1], [], []>} : vector<8x8xbf16>, vector<8x8xbf16>, vector<8x8xf32> -> vector<8x8xf32>
    %74 = tpu.concatenate %19, %37, %55, %73 in 1 : vector<8x8xf32>, vector<8x8xf32>, vector<8x8xf32>, vector<8x8xf32> -> vector<8x32xf32>
    %75 = arith.truncf %74 : vector<8x32xf32> to vector<8x32xbf16>
    %c0_30 = arith.constant 0 : index
    %c0_31 = arith.constant 0 : index
    %76 = vector.load %arg6[%c0_30, %c0_31] : memref<8x32xbf16, #tpu.memory_space<vmem>>, vector<8x32xbf16>
    tpu.vector_store %arg6[%c0_30, %c0_31], %75 {strides = array<i32>} : memref<8x32xbf16, #tpu.memory_space<vmem>>, vector<8x32xbf16>,
    return
  }
  func.func @transform_0(%arg0: i32, %arg1: i32) -> (i32, i32) {
    %c1_i32 = arith.constant 1 : i32
    %0 = arith.muli %arg0, %c1_i32 : i32
    %1 = arith.addi %0, %arg1 : i32
    %c0_i32 = arith.constant 0 : i32
    %c0_i32_0 = arith.constant 0 : i32
    return %1, %c0_i32 : i32, i32
  }
  func.func @transform_1(%arg0: i32, %arg1: i32) -> (i32, i32) {
    %c0_i32 = arith.constant 0 : i32
    %c0_i32_0 = arith.constant 0 : i32
    return %arg0, %c0_i32 : i32, i32
  }
  func.func @transform_2(%arg0: i32, %arg1: i32) -> (i32, i32) {
    %c0_i32 = arith.constant 0 : i32
    %c0_i32_0 = arith.constant 0 : i32
    return %arg0, %c0_i32 : i32, i32
  }
  func.func @transform_3(%arg0: i32, %arg1: i32) -> (i32, i32, i32) {
    %c0_i32 = arith.constant 0 : i32
    %c0_i32_0 = arith.constant 0 : i32
    %c0_i32_1 = arith.constant 0 : i32
    return %arg0, %c0_i32, %c0_i32_0 : i32, i32, i32
  }
  func.func @transform_4(%arg0: i32, %arg1: i32) -> (i32, i32) {
    %c1_i32 = arith.constant 1 : i32
    %0 = arith.muli %arg0, %c1_i32 : i32
    %1 = arith.addi %0, %arg1 : i32
    %c0_i32 = arith.constant 0 : i32
    %c0_i32_0 = arith.constant 0 : i32
    return %1, %c0_i32 : i32, i32
  }
}

module attributes {stable_mosaic.version = 11 : i64} {
  func.func @_linear_res_ln_kernel(%arg0: i32, %arg1: memref<16x32xbf16, #tpu.memory_space<vmem>>, %arg2: memref<32x32xbf16, #tpu.memory_space<vmem>>, %arg3: memref<1x32xf32, #tpu.memory_space<vmem>>, %arg4: memref<16x32xbf16, #tpu.memory_space<vmem>>, %arg5: memref<1x32xf32, #tpu.memory_space<vmem>>, %arg6: memref<1x32xf32, #tpu.memory_space<vmem>>, %arg7: memref<16x32xbf16, #tpu.memory_space<vmem>>) attributes {dimension_semantics = [#tpu.dimension_semantics<parallel>], iteration_bounds = array<i64: 1>, scalar_prefetch = 0 : i64, scratch_operands = 0 : i64, tpu.core_type = #tpu.core_type<tc>, window_params = [{transform_indices = @transform_0, window_bounds = array<i64: 16, 32>}, {pipeline_mode = #tpu.pipeline_mode<synchronous>, transform_indices = @transform_1, window_bounds = array<i64: 32, 32>}, {pipeline_mode = #tpu.pipeline_mode<synchronous>, transform_indices = @transform_2, window_bounds = array<i64: 1, 32>}, {transform_indices = @transform_3, window_bounds = array<i64: 16, 32>}, {pipeline_mode = #tpu.pipeline_mode<synchronous>, transform_indices = @transform_4, window_bounds = array<i64: 1, 32>}, {pipeline_mode = #tpu.pipeline_mode<synchronous>, transform_indices = @transform_5, window_bounds = array<i64: 1, 32>}, {transform_indices = @transform_6, window_bounds = array<i64: 16, 32>}]} {
    %c0 = arith.constant 0 : index
    %c0_0 = arith.constant 0 : index
    %0 = vector.load %arg1[%c0, %c0_0] : memref<16x32xbf16, #tpu.memory_space<vmem>>, vector<16x32xbf16>
    %c0_1 = arith.constant 0 : index
    %c0_2 = arith.constant 0 : index
    %1 = vector.load %arg2[%c0_1, %c0_2] : memref<32x32xbf16, #tpu.memory_space<vmem>>, vector<32x32xbf16>
    %cst = arith.constant dense<0.000000e+00> : vector<16x32xf32>
    %2 = tpu.matmul %0, %1, %cst {dimension_numbers = #tpu.dot_dimension_numbers<[1], [0], [0], [1], [0, 0, 1, 1], [], []>} : vector<16x32xbf16>, vector<32x32xbf16>, vector<16x32xf32> -> vector<16x32xf32>
    %c0_3 = arith.constant 0 : index
    %c0_4 = arith.constant 0 : index
    %3 = vector.load %arg3[%c0_3, %c0_4] : memref<1x32xf32, #tpu.memory_space<vmem>>, vector<1x32xf32>
    %4 = vector.broadcast %3 : vector<1x32xf32> to vector<16x32xf32>
    %5 = arith.addf %2, %4 : vector<16x32xf32>
    %c0_5 = arith.constant 0 : index
    %c0_6 = arith.constant 0 : index
    %6 = vector.load %arg4[%c0_5, %c0_6] : memref<16x32xbf16, #tpu.memory_space<vmem>>, vector<16x32xbf16>
    %7 = arith.extf %6 : vector<16x32xbf16> to vector<16x32xf32>
    %8 = arith.addf %5, %7 : vector<16x32xf32>
    %cst_7 = arith.constant dense<0.000000e+00> : vector<16xf32>
    %9 = vector.multi_reduction <add>, %8, %cst_7 [1] : vector<16x32xf32> to vector<16xf32>
    %10 = vector.shape_cast %9 : vector<16xf32> to vector<16x1xf32>
    %cst_8 = arith.constant 3.200000e+01 : f32
    %11 = vector.broadcast %cst_8 : f32 to vector<16x1xf32>
    %12 = arith.divf %10, %11 : vector<16x1xf32>
    %13 = vector.broadcast %12 : vector<16x1xf32> to vector<16x32xf32>
    %14 = arith.subf %8, %13 : vector<16x32xf32>
    %15 = arith.mulf %14, %14 : vector<16x32xf32>
    %cst_9 = arith.constant dense<0.000000e+00> : vector<16xf32>
    %16 = vector.multi_reduction <add>, %15, %cst_9 [1] : vector<16x32xf32> to vector<16xf32>
    %17 = vector.shape_cast %16 : vector<16xf32> to vector<16x1xf32>
    %cst_10 = arith.constant 3.200000e+01 : f32
    %18 = vector.broadcast %cst_10 : f32 to vector<16x1xf32>
    %19 = arith.divf %17, %18 : vector<16x1xf32>
    %20 = vector.broadcast %12 : vector<16x1xf32> to vector<16x32xf32>
    %21 = arith.subf %8, %20 : vector<16x32xf32>
    %cst_11 = arith.constant 9.99999996E-13 : f32
    %22 = vector.broadcast %cst_11 : f32 to vector<16x1xf32>
    %23 = arith.addf %19, %22 : vector<16x1xf32>
    %24 = math.rsqrt %23 : vector<16x1xf32>
    %25 = vector.broadcast %24 : vector<16x1xf32> to vector<16x32xf32>
    %26 = arith.mulf %21, %25 : vector<16x32xf32>
    %c0_12 = arith.constant 0 : index
    %c0_13 = arith.constant 0 : index
    %27 = vector.load %arg5[%c0_12, %c0_13] : memref<1x32xf32, #tpu.memory_space<vmem>>, vector<1x32xf32>
    %28 = vector.broadcast %27 : vector<1x32xf32> to vector<16x32xf32>
    %29 = arith.mulf %26, %28 : vector<16x32xf32>
    %c0_14 = arith.constant 0 : index
    %c0_15 = arith.constant 0 : index
    %30 = vector.load %arg6[%c0_14, %c0_15] : memref<1x32xf32, #tpu.memory_space<vmem>>, vector<1x32xf32>
    %31 = vector.broadcast %30 : vector<1x32xf32> to vector<16x32xf32>
    %32 = arith.addf %29, %31 : vector<16x32xf32>
    %33 = arith.truncf %32 : vector<16x32xf32> to vector<16x32xbf16>
    %c0_16 = arith.constant 0 : index
    %c0_17 = arith.constant 0 : index
    %34 = vector.load %arg7[%c0_16, %c0_17] : memref<16x32xbf16, #tpu.memory_space<vmem>>, vector<16x32xbf16>
    tpu.vector_store %arg7[%c0_16, %c0_17], %33 {strides = array<i32>} : memref<16x32xbf16, #tpu.memory_space<vmem>>, vector<16x32xbf16>,
    return
  }
  func.func @transform_0(%arg0: i32) -> (i32, i32) {
    %c0_i32 = arith.constant 0 : i32
    %c0_i32_0 = arith.constant 0 : i32
    return %arg0, %c0_i32 : i32, i32
  }
  func.func @transform_1(%arg0: i32) -> (i32, i32) {
    %c0_i32 = arith.constant 0 : i32
    %c0_i32_0 = arith.constant 0 : i32
    %c0_i32_1 = arith.constant 0 : i32
    return %c0_i32, %c0_i32_0 : i32, i32
  }
  func.func @transform_2(%arg0: i32) -> (i32, i32) {
    %c0_i32 = arith.constant 0 : i32
    %c0_i32_0 = arith.constant 0 : i32
    %c0_i32_1 = arith.constant 0 : i32
    return %c0_i32, %c0_i32_0 : i32, i32
  }
  func.func @transform_3(%arg0: i32) -> (i32, i32) {
    %c0_i32 = arith.constant 0 : i32
    %c0_i32_0 = arith.constant 0 : i32
    return %arg0, %c0_i32 : i32, i32
  }
  func.func @transform_4(%arg0: i32) -> (i32, i32) {
    %c0_i32 = arith.constant 0 : i32
    %c0_i32_0 = arith.constant 0 : i32
    %c0_i32_1 = arith.constant 0 : i32
    return %c0_i32, %c0_i32_0 : i32, i32
  }
  func.func @transform_5(%arg0: i32) -> (i32, i32) {
    %c0_i32 = arith.constant 0 : i32
    %c0_i32_0 = arith.constant 0 : i32
    %c0_i32_1 = arith.constant 0 : i32
    return %c0_i32, %c0_i32_0 : i32, i32
  }
  func.func @transform_6(%arg0: i32) -> (i32, i32) {
    %c0_i32 = arith.constant 0 : i32
    %c0_i32_0 = arith.constant 0 : i32
    return %arg0, %c0_i32 : i32, i32
  }
}

module attributes {stable_mosaic.version = 11 : i64} {
  func.func @_layernorm_kernel(%arg0: i32, %arg1: memref<16x32xf32, #tpu.memory_space<vmem>>, %arg2: memref<1x32xf32, #tpu.memory_space<vmem>>, %arg3: memref<1x32xf32, #tpu.memory_space<vmem>>, %arg4: memref<16x32xbf16, #tpu.memory_space<vmem>>) attributes {dimension_semantics = [#tpu.dimension_semantics<parallel>], iteration_bounds = array<i64: 1>, scalar_prefetch = 0 : i64, scratch_operands = 0 : i64, tpu.core_type = #tpu.core_type<tc>, window_params = [{transform_indices = @transform_0, window_bounds = array<i64: 16, 32>}, {pipeline_mode = #tpu.pipeline_mode<synchronous>, transform_indices = @transform_1, window_bounds = array<i64: 1, 32>}, {pipeline_mode = #tpu.pipeline_mode<synchronous>, transform_indices = @transform_2, window_bounds = array<i64: 1, 32>}, {transform_indices = @transform_3, window_bounds = array<i64: 16, 32>}]} {
    %c0 = arith.constant 0 : index
    %c0_0 = arith.constant 0 : index
    %0 = vector.load %arg1[%c0, %c0_0] : memref<16x32xf32, #tpu.memory_space<vmem>>, vector<16x32xf32>
    %cst = arith.constant dense<0.000000e+00> : vector<16xf32>
    %1 = vector.multi_reduction <add>, %0, %cst [1] : vector<16x32xf32> to vector<16xf32>
    %2 = vector.shape_cast %1 : vector<16xf32> to vector<16x1xf32>
    %cst_1 = arith.constant 3.200000e+01 : f32
    %3 = vector.broadcast %cst_1 : f32 to vector<16x1xf32>
    %4 = arith.divf %2, %3 : vector<16x1xf32>
    %5 = vector.broadcast %4 : vector<16x1xf32> to vector<16x32xf32>
    %6 = arith.subf %0, %5 : vector<16x32xf32>
    %7 = arith.mulf %6, %6 : vector<16x32xf32>
    %cst_2 = arith.constant dense<0.000000e+00> : vector<16xf32>
    %8 = vector.multi_reduction <add>, %7, %cst_2 [1] : vector<16x32xf32> to vector<16xf32>
    %9 = vector.shape_cast %8 : vector<16xf32> to vector<16x1xf32>
    %cst_3 = arith.constant 3.200000e+01 : f32
    %10 = vector.broadcast %cst_3 : f32 to vector<16x1xf32>
    %11 = arith.divf %9, %10 : vector<16x1xf32>
    %12 = vector.broadcast %4 : vector<16x1xf32> to vector<16x32xf32>
    %13 = arith.subf %0, %12 : vector<16x32xf32>
    %cst_4 = arith.constant 9.99999996E-13 : f32
    %14 = vector.broadcast %cst_4 : f32 to vector<16x1xf32>
    %15 = arith.addf %11, %14 : vector<16x1xf32>
    %16 = math.rsqrt %15 : vector<16x1xf32>
    %17 = vector.broadcast %16 : vector<16x1xf32> to vector<16x32xf32>
    %18 = arith.mulf %13, %17 : vector<16x32xf32>
    %c0_5 = arith.constant 0 : index
    %c0_6 = arith.constant 0 : index
    %19 = vector.load %arg2[%c0_5, %c0_6] : memref<1x32xf32, #tpu.memory_space<vmem>>, vector<1x32xf32>
    %20 = vector.broadcast %19 : vector<1x32xf32> to vector<16x32xf32>
    %21 = arith.mulf %18, %20 : vector<16x32xf32>
    %c0_7 = arith.constant 0 : index
    %c0_8 = arith.constant 0 : index
    %22 = vector.load %arg3[%c0_7, %c0_8] : memref<1x32xf32, #tpu.memory_space<vmem>>, vector<1x32xf32>
    %23 = vector.broadcast %22 : vector<1x32xf32> to vector<16x32xf32>
    %24 = arith.addf %21, %23 : vector<16x32xf32>
    %25 = arith.truncf %24 : vector<16x32xf32> to vector<16x32xbf16>
    %c0_9 = arith.constant 0 : index
    %c0_10 = arith.constant 0 : index
    %26 = vector.load %arg4[%c0_9, %c0_10] : memref<16x32xbf16, #tpu.memory_space<vmem>>, vector<16x32xbf16>
    tpu.vector_store %arg4[%c0_9, %c0_10], %25 {strides = array<i32>} : memref<16x32xbf16, #tpu.memory_space<vmem>>, vector<16x32xbf16>,
    return
  }
  func.func @transform_0(%arg0: i32) -> (i32, i32) {
    %c0_i32 = arith.constant 0 : i32
    %c0_i32_0 = arith.constant 0 : i32
    return %arg0, %c0_i32 : i32, i32
  }
  func.func @transform_1(%arg0: i32) -> (i32, i32) {
    %c0_i32 = arith.constant 0 : i32
    %c0_i32_0 = arith.constant 0 : i32
    %c0_i32_1 = arith.constant 0 : i32
    return %c0_i32, %c0_i32_0 : i32, i32
  }
  func.func @transform_2(%arg0: i32) -> (i32, i32) {
    %c0_i32 = arith.constant 0 : i32
    %c0_i32_0 = arith.constant 0 : i32
    %c0_i32_1 = arith.constant 0 : i32
    return %c0_i32, %c0_i32_0 : i32, i32
  }
  func.func @transform_3(%arg0: i32) -> (i32, i32) {
    %c0_i32 = arith.constant 0 : i32
    %c0_i32_0 = arith.constant 0 : i32
    return %arg0, %c0_i32 : i32, i32
  }
}

module attributes {stable_mosaic.version = 11 : i64} {
  func.func @_linear_kernel(%arg0: i32, %arg1: memref<16x32xbf16, #tpu.memory_space<vmem>>, %arg2: memref<32x96xbf16, #tpu.memory_space<vmem>>, %arg3: memref<1x96xf32, #tpu.memory_space<vmem>>, %arg4: memref<16x96xbf16, #tpu.memory_space<vmem>>) attributes {dimension_semantics = [#tpu.dimension_semantics<parallel>], iteration_bounds = array<i64: 1>, scalar_prefetch = 0 : i64, scratch_operands = 0 : i64, tpu.core_type = #tpu.core_type<tc>, window_params = [{transform_indices = @transform_0, window_bounds = array<i64: 16, 32>}, {pipeline_mode = #tpu.pipeline_mode<synchronous>, transform_indices = @transform_1, window_bounds = array<i64: 32, 96>}, {pipeline_mode = #tpu.pipeline_mode<synchronous>, transform_indices = @transform_2, window_bounds = array<i64: 1, 96>}, {transform_indices = @transform_3, window_bounds = array<i64: 16, 96>}]} {
    %c0 = arith.constant 0 : index
    %c0_0 = arith.constant 0 : index
    %0 = vector.load %arg1[%c0, %c0_0] : memref<16x32xbf16, #tpu.memory_space<vmem>>, vector<16x32xbf16>
    %c0_1 = arith.constant 0 : index
    %c0_2 = arith.constant 0 : index
    %1 = vector.load %arg2[%c0_1, %c0_2] : memref<32x96xbf16, #tpu.memory_space<vmem>>, vector<32x96xbf16>
    %cst = arith.constant dense<0.000000e+00> : vector<16x96xf32>
    %2 = tpu.matmul %0, %1, %cst {dimension_numbers = #tpu.dot_dimension_numbers<[1], [0], [0], [1], [0, 0, 1, 1], [], []>} : vector<16x32xbf16>, vector<32x96xbf16>, vector<16x96xf32> -> vector<16x96xf32>
    %c0_3 = arith.constant 0 : index
    %c0_4 = arith.constant 0 : index
    %3 = vector.load %arg3[%c0_3, %c0_4] : memref<1x96xf32, #tpu.memory_space<vmem>>, vector<1x96xf32>
    %4 = vector.broadcast %3 : vector<1x96xf32> to vector<16x96xf32>
    %5 = arith.addf %2, %4 : vector<16x96xf32>
    %6 = arith.truncf %5 : vector<16x96xf32> to vector<16x96xbf16>
    %c0_5 = arith.constant 0 : index
    %c0_6 = arith.constant 0 : index
    %7 = vector.load %arg4[%c0_5, %c0_6] : memref<16x96xbf16, #tpu.memory_space<vmem>>, vector<16x96xbf16>
    tpu.vector_store %arg4[%c0_5, %c0_6], %6 {strides = array<i32>} : memref<16x96xbf16, #tpu.memory_space<vmem>>, vector<16x96xbf16>,
    return
  }
  func.func @transform_0(%arg0: i32) -> (i32, i32) {
    %c0_i32 = arith.constant 0 : i32
    %c0_i32_0 = arith.constant 0 : i32
    return %arg0, %c0_i32 : i32, i32
  }
  func.func @transform_1(%arg0: i32) -> (i32, i32) {
    %c0_i32 = arith.constant 0 : i32
    %c0_i32_0 = arith.constant 0 : i32
    %c0_i32_1 = arith.constant 0 : i32
    return %c0_i32, %c0_i32_0 : i32, i32
  }
  func.func @transform_2(%arg0: i32) -> (i32, i32) {
    %c0_i32 = arith.constant 0 : i32
    %c0_i32_0 = arith.constant 0 : i32
    %c0_i32_1 = arith.constant 0 : i32
    return %c0_i32, %c0_i32_0 : i32, i32
  }
  func.func @transform_3(%arg0: i32) -> (i32, i32) {
    %c0_i32 = arith.constant 0 : i32
    %c0_i32_0 = arith.constant 0 : i32
    return %arg0, %c0_i32 : i32, i32
  }
}

module attributes {stable_mosaic.version = 11 : i64} {
  func.func @_linear_kernel(%arg0: i32, %arg1: memref<16x32xbf16, #tpu.memory_space<vmem>>, %arg2: memref<32x64xbf16, #tpu.memory_space<vmem>>, %arg3: memref<1x64xf32, #tpu.memory_space<vmem>>, %arg4: memref<16x64xbf16, #tpu.memory_space<vmem>>) attributes {dimension_semantics = [#tpu.dimension_semantics<parallel>], iteration_bounds = array<i64: 1>, scalar_prefetch = 0 : i64, scratch_operands = 0 : i64, tpu.core_type = #tpu.core_type<tc>, window_params = [{transform_indices = @transform_0, window_bounds = array<i64: 16, 32>}, {pipeline_mode = #tpu.pipeline_mode<synchronous>, transform_indices = @transform_1, window_bounds = array<i64: 32, 64>}, {pipeline_mode = #tpu.pipeline_mode<synchronous>, transform_indices = @transform_2, window_bounds = array<i64: 1, 64>}, {transform_indices = @transform_3, window_bounds = array<i64: 16, 64>}]} {
    %c0 = arith.constant 0 : index
    %c0_0 = arith.constant 0 : index
    %0 = vector.load %arg1[%c0, %c0_0] : memref<16x32xbf16, #tpu.memory_space<vmem>>, vector<16x32xbf16>
    %c0_1 = arith.constant 0 : index
    %c0_2 = arith.constant 0 : index
    %1 = vector.load %arg2[%c0_1, %c0_2] : memref<32x64xbf16, #tpu.memory_space<vmem>>, vector<32x64xbf16>
    %cst = arith.constant dense<0.000000e+00> : vector<16x64xf32>
    %2 = tpu.matmul %0, %1, %cst {dimension_numbers = #tpu.dot_dimension_numbers<[1], [0], [0], [1], [0, 0, 1, 1], [], []>} : vector<16x32xbf16>, vector<32x64xbf16>, vector<16x64xf32> -> vector<16x64xf32>
    %c0_3 = arith.constant 0 : index
    %c0_4 = arith.constant 0 : index
    %3 = vector.load %arg3[%c0_3, %c0_4] : memref<1x64xf32, #tpu.memory_space<vmem>>, vector<1x64xf32>
    %4 = vector.broadcast %3 : vector<1x64xf32> to vector<16x64xf32>
    %5 = arith.addf %2, %4 : vector<16x64xf32>
    %cst_5 = arith.constant 5.000000e-01 : f32
    %6 = vector.broadcast %cst_5 : f32 to vector<16x64xf32>
    %7 = arith.mulf %6, %5 : vector<16x64xf32>
    %cst_6 = arith.constant 0.707106769 : f32
    %8 = vector.broadcast %cst_6 : f32 to vector<16x64xf32>
    %9 = arith.mulf %5, %8 : vector<16x64xf32>
    %10 = math.erf %9 : vector<16x64xf32>
    %cst_7 = arith.constant 1.000000e+00 : f32
    %11 = vector.broadcast %cst_7 : f32 to vector<16x64xf32>
    %12 = arith.addf %11, %10 : vector<16x64xf32>
    %13 = arith.mulf %7, %12 : vector<16x64xf32>
    %14 = arith.truncf %13 : vector<16x64xf32> to vector<16x64xbf16>
    %c0_8 = arith.constant 0 : index
    %c0_9 = arith.constant 0 : index
    %15 = vector.load %arg4[%c0_8, %c0_9] : memref<16x64xbf16, #tpu.memory_space<vmem>>, vector<16x64xbf16>
    tpu.vector_store %arg4[%c0_8, %c0_9], %14 {strides = array<i32>} : memref<16x64xbf16, #tpu.memory_space<vmem>>, vector<16x64xbf16>,
    return
  }
  func.func @transform_0(%arg0: i32) -> (i32, i32) {
    %c0_i32 = arith.constant 0 : i32
    %c0_i32_0 = arith.constant 0 : i32
    return %arg0, %c0_i32 : i32, i32
  }
  func.func @transform_1(%arg0: i32) -> (i32, i32) {
    %c0_i32 = arith.constant 0 : i32
    %c0_i32_0 = arith.constant 0 : i32
    %c0_i32_1 = arith.constant 0 : i32
    return %c0_i32, %c0_i32_0 : i32, i32
  }
  func.func @transform_2(%arg0: i32) -> (i32, i32) {
    %c0_i32 = arith.constant 0 : i32
    %c0_i32_0 = arith.constant 0 : i32
    %c0_i32_1 = arith.constant 0 : i32
    return %c0_i32, %c0_i32_0 : i32, i32
  }
  func.func @transform_3(%arg0: i32) -> (i32, i32) {
    %c0_i32 = arith.constant 0 : i32
    %c0_i32_0 = arith.constant 0 : i32
    return %arg0, %c0_i32 : i32, i32
  }
}

module attributes {stable_mosaic.version = 11 : i64} {
  func.func @_linear_res_ln_kernel(%arg0: i32, %arg1: memref<16x64xbf16, #tpu.memory_space<vmem>>, %arg2: memref<64x32xbf16, #tpu.memory_space<vmem>>, %arg3: memref<1x32xf32, #tpu.memory_space<vmem>>, %arg4: memref<16x32xbf16, #tpu.memory_space<vmem>>, %arg5: memref<1x32xf32, #tpu.memory_space<vmem>>, %arg6: memref<1x32xf32, #tpu.memory_space<vmem>>, %arg7: memref<16x32xbf16, #tpu.memory_space<vmem>>) attributes {dimension_semantics = [#tpu.dimension_semantics<parallel>], iteration_bounds = array<i64: 1>, scalar_prefetch = 0 : i64, scratch_operands = 0 : i64, tpu.core_type = #tpu.core_type<tc>, window_params = [{transform_indices = @transform_0, window_bounds = array<i64: 16, 64>}, {pipeline_mode = #tpu.pipeline_mode<synchronous>, transform_indices = @transform_1, window_bounds = array<i64: 64, 32>}, {pipeline_mode = #tpu.pipeline_mode<synchronous>, transform_indices = @transform_2, window_bounds = array<i64: 1, 32>}, {transform_indices = @transform_3, window_bounds = array<i64: 16, 32>}, {pipeline_mode = #tpu.pipeline_mode<synchronous>, transform_indices = @transform_4, window_bounds = array<i64: 1, 32>}, {pipeline_mode = #tpu.pipeline_mode<synchronous>, transform_indices = @transform_5, window_bounds = array<i64: 1, 32>}, {transform_indices = @transform_6, window_bounds = array<i64: 16, 32>}]} {
    %c0 = arith.constant 0 : index
    %c0_0 = arith.constant 0 : index
    %0 = vector.load %arg1[%c0, %c0_0] : memref<16x64xbf16, #tpu.memory_space<vmem>>, vector<16x64xbf16>
    %c0_1 = arith.constant 0 : index
    %c0_2 = arith.constant 0 : index
    %1 = vector.load %arg2[%c0_1, %c0_2] : memref<64x32xbf16, #tpu.memory_space<vmem>>, vector<64x32xbf16>
    %cst = arith.constant dense<0.000000e+00> : vector<16x32xf32>
    %2 = tpu.matmul %0, %1, %cst {dimension_numbers = #tpu.dot_dimension_numbers<[1], [0], [0], [1], [0, 0, 1, 1], [], []>} : vector<16x64xbf16>, vector<64x32xbf16>, vector<16x32xf32> -> vector<16x32xf32>
    %c0_3 = arith.constant 0 : index
    %c0_4 = arith.constant 0 : index
    %3 = vector.load %arg3[%c0_3, %c0_4] : memref<1x32xf32, #tpu.memory_space<vmem>>, vector<1x32xf32>
    %4 = vector.broadcast %3 : vector<1x32xf32> to vector<16x32xf32>
    %5 = arith.addf %2, %4 : vector<16x32xf32>
    %c0_5 = arith.constant 0 : index
    %c0_6 = arith.constant 0 : index
    %6 = vector.load %arg4[%c0_5, %c0_6] : memref<16x32xbf16, #tpu.memory_space<vmem>>, vector<16x32xbf16>
    %7 = arith.extf %6 : vector<16x32xbf16> to vector<16x32xf32>
    %8 = arith.addf %5, %7 : vector<16x32xf32>
    %cst_7 = arith.constant dense<0.000000e+00> : vector<16xf32>
    %9 = vector.multi_reduction <add>, %8, %cst_7 [1] : vector<16x32xf32> to vector<16xf32>
    %10 = vector.shape_cast %9 : vector<16xf32> to vector<16x1xf32>
    %cst_8 = arith.constant 3.200000e+01 : f32
    %11 = vector.broadcast %cst_8 : f32 to vector<16x1xf32>
    %12 = arith.divf %10, %11 : vector<16x1xf32>
    %13 = vector.broadcast %12 : vector<16x1xf32> to vector<16x32xf32>
    %14 = arith.subf %8, %13 : vector<16x32xf32>
    %15 = arith.mulf %14, %14 : vector<16x32xf32>
    %cst_9 = arith.constant dense<0.000000e+00> : vector<16xf32>
    %16 = vector.multi_reduction <add>, %15, %cst_9 [1] : vector<16x32xf32> to vector<16xf32>
    %17 = vector.shape_cast %16 : vector<16xf32> to vector<16x1xf32>
    %cst_10 = arith.constant 3.200000e+01 : f32
    %18 = vector.broadcast %cst_10 : f32 to vector<16x1xf32>
    %19 = arith.divf %17, %18 : vector<16x1xf32>
    %20 = vector.broadcast %12 : vector<16x1xf32> to vector<16x32xf32>
    %21 = arith.subf %8, %20 : vector<16x32xf32>
    %cst_11 = arith.constant 9.99999996E-13 : f32
    %22 = vector.broadcast %cst_11 : f32 to vector<16x1xf32>
    %23 = arith.addf %19, %22 : vector<16x1xf32>
    %24 = math.rsqrt %23 : vector<16x1xf32>
    %25 = vector.broadcast %24 : vector<16x1xf32> to vector<16x32xf32>
    %26 = arith.mulf %21, %25 : vector<16x32xf32>
    %c0_12 = arith.constant 0 : index
    %c0_13 = arith.constant 0 : index
    %27 = vector.load %arg5[%c0_12, %c0_13] : memref<1x32xf32, #tpu.memory_space<vmem>>, vector<1x32xf32>
    %28 = vector.broadcast %27 : vector<1x32xf32> to vector<16x32xf32>
    %29 = arith.mulf %26, %28 : vector<16x32xf32>
    %c0_14 = arith.constant 0 : index
    %c0_15 = arith.constant 0 : index
    %30 = vector.load %arg6[%c0_14, %c0_15] : memref<1x32xf32, #tpu.memory_space<vmem>>, vector<1x32xf32>
    %31 = vector.broadcast %30 : vector<1x32xf32> to vector<16x32xf32>
    %32 = arith.addf %29, %31 : vector<16x32xf32>
    %33 = arith.truncf %32 : vector<16x32xf32> to vector<16x32xbf16>
    %c0_16 = arith.constant 0 : index
    %c0_17 = arith.constant 0 : index
    %34 = vector.load %arg7[%c0_16, %c0_17] : memref<16x32xbf16, #tpu.memory_space<vmem>>, vector<16x32xbf16>
    tpu.vector_store %arg7[%c0_16, %c0_17], %33 {strides = array<i32>} : memref<16x32xbf16, #tpu.memory_space<vmem>>, vector<16x32xbf16>,
    return
  }
  func.func @transform_0(%arg0: i32) -> (i32, i32) {
    %c0_i32 = arith.constant 0 : i32
    %c0_i32_0 = arith.constant 0 : i32
    return %arg0, %c0_i32 : i32, i32
  }
  func.func @transform_1(%arg0: i32) -> (i32, i32) {
    %c0_i32 = arith.constant 0 : i32
    %c0_i32_0 = arith.constant 0 : i32
    %c0_i32_1 = arith.constant 0 : i32
    return %c0_i32, %c0_i32_0 : i32, i32
  }
  func.func @transform_2(%arg0: i32) -> (i32, i32) {
    %c0_i32 = arith.constant 0 : i32
    %c0_i32_0 = arith.constant 0 : i32
    %c0_i32_1 = arith.constant 0 : i32
    return %c0_i32, %c0_i32_0 : i32, i32
  }
  func.func @transform_3(%arg0: i32) -> (i32, i32) {
    %c0_i32 = arith.constant 0 : i32
    %c0_i32_0 = arith.constant 0 : i32
    return %arg0, %c0_i32 : i32, i32
  }
  func.func @transform_4(%arg0: i32) -> (i32, i32) {
    %c0_i32 = arith.constant 0 : i32
    %c0_i32_0 = arith.constant 0 : i32
    %c0_i32_1 = arith.constant 0 : i32
    return %c0_i32, %c0_i32_0 : i32, i32
  }
  func.func @transform_5(%arg0: i32) -> (i32, i32) {
    %c0_i32 = arith.constant 0 : i32
    %c0_i32_0 = arith.constant 0 : i32
    %c0_i32_1 = arith.constant 0 : i32
    return %c0_i32, %c0_i32_0 : i32, i32
  }
  func.func @transform_6(%arg0: i32) -> (i32, i32) {
    %c0_i32 = arith.constant 0 : i32
    %c0_i32_0 = arith.constant 0 : i32
    return %arg0, %c0_i32 : i32, i32
  }
}

module attributes {stable_mosaic.version = 11 : i64} {
  func.func @_head_kernel(%arg0: i32, %arg1: memref<2x32xbf16, #tpu.memory_space<vmem>>, %arg2: memref<32x32xbf16, #tpu.memory_space<vmem>>, %arg3: memref<1x32xf32, #tpu.memory_space<vmem>>, %arg4: memref<32x4xbf16, #tpu.memory_space<vmem>>, %arg5: memref<1x4xf32, #tpu.memory_space<vmem>>, %arg6: memref<2x1xi32, #tpu.memory_space<vmem>>, %arg7: memref<1x1xf32, #tpu.memory_space<vmem>>, %arg8: memref<2x4xf32, #tpu.memory_space<vmem>>, %arg9: memref<2x4xf32, #tpu.memory_space<vmem>>) attributes {dimension_semantics = [#tpu.dimension_semantics<arbitrary>], iteration_bounds = array<i64: 1>, scalar_prefetch = 0 : i64, scratch_operands = 0 : i64, tpu.core_type = #tpu.core_type<tc>, window_params = [{pipeline_mode = #tpu.pipeline_mode<synchronous>, transform_indices = @transform_0, window_bounds = array<i64: 2, 32>}, {pipeline_mode = #tpu.pipeline_mode<synchronous>, transform_indices = @transform_1, window_bounds = array<i64: 32, 32>}, {pipeline_mode = #tpu.pipeline_mode<synchronous>, transform_indices = @transform_2, window_bounds = array<i64: 1, 32>}, {pipeline_mode = #tpu.pipeline_mode<synchronous>, transform_indices = @transform_3, window_bounds = array<i64: 32, 4>}, {pipeline_mode = #tpu.pipeline_mode<synchronous>, transform_indices = @transform_4, window_bounds = array<i64: 1, 4>}, {pipeline_mode = #tpu.pipeline_mode<synchronous>, transform_indices = @transform_5, window_bounds = array<i64: 2, 1>}, {pipeline_mode = #tpu.pipeline_mode<synchronous>, transform_indices = @transform_6, window_bounds = array<i64: 1, 1>}, {pipeline_mode = #tpu.pipeline_mode<synchronous>, transform_indices = @transform_7, window_bounds = array<i64: 2, 4>}, {pipeline_mode = #tpu.pipeline_mode<synchronous>, transform_indices = @transform_8, window_bounds = array<i64: 2, 4>}]} {
    %c0 = arith.constant 0 : index
    %c0_0 = arith.constant 0 : index
    %0 = vector.load %arg1[%c0, %c0_0] : memref<2x32xbf16, #tpu.memory_space<vmem>>, vector<2x32xbf16>
    %c0_1 = arith.constant 0 : index
    %c0_2 = arith.constant 0 : index
    %1 = vector.load %arg2[%c0_1, %c0_2] : memref<32x32xbf16, #tpu.memory_space<vmem>>, vector<32x32xbf16>
    %cst = arith.constant dense<0.000000e+00> : vector<2x32xf32>
    %2 = tpu.matmul %0, %1, %cst {dimension_numbers = #tpu.dot_dimension_numbers<[1], [0], [0], [1], [0, 0, 1, 1], [], []>} : vector<2x32xbf16>, vector<32x32xbf16>, vector<2x32xf32> -> vector<2x32xf32>
    %c0_3 = arith.constant 0 : index
    %c0_4 = arith.constant 0 : index
    %3 = vector.load %arg3[%c0_3, %c0_4] : memref<1x32xf32, #tpu.memory_space<vmem>>, vector<1x32xf32>
    %4 = vector.broadcast %3 : vector<1x32xf32> to vector<2x32xf32>
    %5 = arith.addf %2, %4 : vector<2x32xf32>
    %6 = math.tanh %5 : vector<2x32xf32>
    %7 = arith.truncf %6 : vector<2x32xf32> to vector<2x32xbf16>
    %c0_5 = arith.constant 0 : index
    %c0_6 = arith.constant 0 : index
    %8 = vector.load %arg4[%c0_5, %c0_6] : memref<32x4xbf16, #tpu.memory_space<vmem>>, vector<32x4xbf16>
    %cst_7 = arith.constant dense<0.000000e+00> : vector<2x4xf32>
    %9 = tpu.matmul %7, %8, %cst_7 {dimension_numbers = #tpu.dot_dimension_numbers<[1], [0], [0], [1], [0, 0, 1, 1], [], []>} : vector<2x32xbf16>, vector<32x4xbf16>, vector<2x4xf32> -> vector<2x4xf32>
    %c0_8 = arith.constant 0 : index
    %c0_9 = arith.constant 0 : index
    %10 = vector.load %arg5[%c0_8, %c0_9] : memref<1x4xf32, #tpu.memory_space<vmem>>, vector<1x4xf32>
    %11 = vector.broadcast %10 : vector<1x4xf32> to vector<2x4xf32>
    %12 = arith.addf %9, %11 : vector<2x4xf32>
    %c0_10 = arith.constant 0 : index
    %c0_11 = arith.constant 0 : index
    %13 = vector.load %arg8[%c0_10, %c0_11] : memref<2x4xf32, #tpu.memory_space<vmem>>, vector<2x4xf32>
    tpu.vector_store %arg8[%c0_10, %c0_11], %12 {strides = array<i32>} : memref<2x4xf32, #tpu.memory_space<vmem>>, vector<2x4xf32>,
    %cst_12 = arith.constant dense<0xFF800000> : vector<2xf32>
    %14 = vector.multi_reduction <maximumf>, %12, %cst_12 [1] : vector<2x4xf32> to vector<2xf32>
    %15 = vector.shape_cast %14 : vector<2xf32> to vector<2x1xf32>
    %16 = vector.broadcast %15 : vector<2x1xf32> to vector<2x4xf32>
    %17 = arith.subf %12, %16 : vector<2x4xf32>
    %18 = math.exp %17 : vector<2x4xf32>
    %cst_13 = arith.constant dense<0.000000e+00> : vector<2xf32>
    %19 = vector.multi_reduction <add>, %18, %cst_13 [1] : vector<2x4xf32> to vector<2xf32>
    %20 = vector.shape_cast %19 : vector<2xf32> to vector<2x1xf32>
    %21 = vector.broadcast %20 : vector<2x1xf32> to vector<2x4xf32>
    %22 = arith.divf %18, %21 : vector<2x4xf32>
    %c0_14 = arith.constant 0 : index
    %c0_15 = arith.constant 0 : index
    %23 = vector.load %arg9[%c0_14, %c0_15] : memref<2x4xf32, #tpu.memory_space<vmem>>, vector<2x4xf32>
    tpu.vector_store %arg9[%c0_14, %c0_15], %22 {strides = array<i32>} : memref<2x4xf32, #tpu.memory_space<vmem>>, vector<2x4xf32>,
    %24 = math.log %20 : vector<2x1xf32>
    %25 = arith.addf %24, %15 : vector<2x1xf32>
    %26 = tpu.iota {dimensions = array<i32: 1>} : vector<2x4xi32>
    %c0_16 = arith.constant 0 : index
    %c0_17 = arith.constant 0 : index
    %27 = vector.load %arg6[%c0_16, %c0_17] : memref<2x1xi32, #tpu.memory_space<vmem>>, vector<2x1xi32>
    %28 = vector.broadcast %27 : vector<2x1xi32> to vector<2x4xi32>
    %29 = arith.cmpi eq, %26, %28 : vector<2x4xi32>
    %30 = arith.extui %29 : vector<2x4xi1> to vector<2x4xi32>
    %31 = arith.sitofp %30 : vector<2x4xi32> to vector<2x4xf32>
    %32 = arith.mulf %12, %31 : vector<2x4xf32>
    %cst_18 = arith.constant dense<0.000000e+00> : vector<2xf32>
    %33 = vector.multi_reduction <add>, %32, %cst_18 [1] : vector<2x4xf32> to vector<2xf32>
    %34 = vector.shape_cast %33 : vector<2xf32> to vector<2x1xf32>
    %35 = arith.subf %25, %34 : vector<2x1xf32>
    %36 = vector.shape_cast %35 : vector<2x1xf32> to vector<1x2x1xf32>
    %cst_19 = arith.constant dense<0.000000e+00> : vector<1xf32>
    %37 = vector.multi_reduction <add>, %36, %cst_19 [1, 2] : vector<1x2x1xf32> to vector<1xf32>
    %38 = vector.shape_cast %37 : vector<1xf32> to vector<1x1x1xf32>
    %39 = vector.extract %38[0, 0, 0] : f32 from vector<1x1x1xf32>
    %cst_20 = arith.constant 2.000000e+00 : f32
    %40 = arith.divf %39, %cst_20 : f32
    %41 = vector.broadcast %40 : f32 to vector<1x1xf32>
    %c0_21 = arith.constant 0 : index
    %c0_22 = arith.constant 0 : index
    %42 = vector.load %arg7[%c0_21, %c0_22] : memref<1x1xf32, #tpu.memory_space<vmem>>, vector<1x1xf32>
    tpu.vector_store %arg7[%c0_21, %c0_22], %41 {strides = array<i32>} : memref<1x1xf32, #tpu.memory_space<vmem>>, vector<1x1xf32>,
    return
  }
  func.func @transform_0(%arg0: i32) -> (i32, i32) {
    %c0_i32 = arith.constant 0 : i32
    %c0_i32_0 = arith.constant 0 : i32
    %c0_i32_1 = arith.constant 0 : i32
    return %c0_i32, %c0_i32_0 : i32, i32
  }
  func.func @transform_1(%arg0: i32) -> (i32, i32) {
    %c0_i32 = arith.constant 0 : i32
    %c0_i32_0 = arith.constant 0 : i32
    %c0_i32_1 = arith.constant 0 : i32
    return %c0_i32, %c0_i32_0 : i32, i32
  }
  func.func @transform_2(%arg0: i32) -> (i32, i32) {
    %c0_i32 = arith.constant 0 : i32
    %c0_i32_0 = arith.constant 0 : i32
    %c0_i32_1 = arith.constant 0 : i32
    return %c0_i32, %c0_i32_0 : i32, i32
  }
  func.func @transform_3(%arg0: i32) -> (i32, i32) {
    %c0_i32 = arith.constant 0 : i32
    %c0_i32_0 = arith.constant 0 : i32
    %c0_i32_1 = arith.constant 0 : i32
    return %c0_i32, %c0_i32_0 : i32, i32
  }
  func.func @transform_4(%arg0: i32) -> (i32, i32) {
    %c0_i32 = arith.constant 0 : i32
    %c0_i32_0 = arith.constant 0 : i32
    %c0_i32_1 = arith.constant 0 : i32
    return %c0_i32, %c0_i32_0 : i32, i32
  }
  func.func @transform_5(%arg0: i32) -> (i32, i32) {
    %c0_i32 = arith.constant 0 : i32
    %c0_i32_0 = arith.constant 0 : i32
    %c0_i32_1 = arith.constant 0 : i32
    return %c0_i32, %c0_i32_0 : i32, i32
  }
  func.func @transform_6(%arg0: i32) -> (i32, i32) {
    %c0_i32 = arith.constant 0 : i32
    %c0_i32_0 = arith.constant 0 : i32
    %c0_i32_1 = arith.constant 0 : i32
    return %c0_i32, %c0_i32_0 : i32, i32
  }
  func.func @transform_7(%arg0: i32) -> (i32, i32) {
    %c0_i32 = arith.constant 0 : i32
    %c0_i32_0 = arith.constant 0 : i32
    %c0_i32_1 = arith.constant 0 : i32
    return %c0_i32, %c0_i32_0 : i32, i32
  }
  func.func @transform_8(%arg0: i32) -> (i32, i32) {
    %c0_i32 = arith.constant 0 : i32
    %c0_i32_0 = arith.constant 0 : i32
    %c0_i32_1 = arith.constant 0 : i32
    return %c0_i32, %c0_i32_0 : i32, i32
  }
}

</mosaic_0001>

<bundles_post_ra>
// kernel: _lambda_.12
= control target key start
LH: loop header
LB: loop body
LE: loop exit
PB: predicated region body
PF: predicated region fallthrough
CT: control target
= control target key end

     0   :  { %vm16_vm0 = vcmask 261120   ;;  %vm70_vm1 = vcmask 257024   ;;  %s129_s0 = inlined_call_operand.vmem [shape: f32[16,32], index: 0, kind: input, shape index: {}]   ;;  %s130_s1 = inlined_call_operand.vmem [shape: f32[1,32], index: 1, kind: input, shape index: {}]   ;;  %s131_s2 = inlined_call_operand.vmem [shape: f32[1,32], index: 2, kind: input, shape index: {}]   ;;  %s132_s3 = inlined_call_operand.vmem [shape: bf16[16,32], index: 3, kind: output, shape index: {}]  }
   0x1   :  { %v14_v0 = vld [vmem:[%s129_s0] sm:$0xff]  ;;  %v15_v1 = vld [vmem:[%s129_s0 + $0x8] sm:$0xff] }
   0x2   :  { %v17_v2 = vsel %vm16_vm0, %v14_v0, 0.0  ;;  %v20_v3 = vsel %vm16_vm0, %v15_v1, 0.0  ;;  %v77_v21 = vld [vmem:[%s130_s1] ss:$0 sm:$0xff] }
   0x3   :  { %18 = vadd.xlane.f32.xlu0 %v17_v2  ;;  %v78_v23 = vld [vmem:[%s131_s2] ss:$0 sm:$0xff] }
   0x7   :  { %21 = vadd.xlane.f32.xlu0 %v20_v3 }
  0x8c   :  { %v19_v4 = vpop.xlane.xlu0 %18 }
  0x8d   :  { %v24_v5 = vmul.f32 0.03125, %v19_v4 }
  0x8f   :  { %v26_v6 = vsub.f32 %v14_v0, %v24_v5 }
  0x90   :  { %v22_v7 = vpop.xlane.xlu0 %21 }
  0x91   :  { %v25_v8 = vmul.f32 0.03125, %v22_v7  ;;  %v28_v9 = vmul.f32 %v26_v6, %v26_v6 }
  0x93   :  { %v27_v10 = vsub.f32 %v15_v1, %v25_v8  ;;  %v30_v11 = vsel %vm16_vm0, %v28_v9, 0.0 }
  0x94   :  { %31 = vadd.xlane.f32.xlu1 %v30_v11 }
  0x95   :  { %v29_v12 = vmul.f32 %v27_v10, %v27_v10 }
  0x97   :  { %v33_v13 = vsel %vm16_vm0, %v29_v12, 0.0 }
  0x98   :  { %34 = vadd.xlane.f32.xlu1 %v33_v13 }
 0x11d   :  { %v32_v14 = vpop.xlane.xlu1 %31 }
 0x11e   :  { %v36_v15 = vmul.f32 0.03125, %v32_v14 }
 0x120   :  { %v38_v16 = vadd.f32 1e-12, %v36_v15 }
 0x121   :  { %v35_v17 = vpop.xlane.xlu1 %34 }
 0x122   :  { %83 = vrsqrt.f32 %v38_v16  ;;  %v37_v18 = vmul.f32 0.03125, %v35_v17 }
 0x124   :  { %v39_v19 = vadd.f32 1e-12, %v37_v18 }
 0x126   :  { %85 = vrsqrt.f32 %v39_v19 }
 0x12f   :  { %v84_v20 = vpop.eup %83 }
 0x130   :  { %v42_v22 = vmul.f32 %v84_v20, %v26_v6 }
 0x132   :  { %v51_v24 = vmul.f32 %v77_v21, %v42_v22 }
 0x133   :  { %v86_v25 = vpop.eup %85 }
 0x134   :  { %v60_v26 = vadd.f32 %v78_v23, %v51_v24  ;;  %v43_v27 = vmul.f32 %v86_v25, %v27_v10 }
 0x136   :  { %v81_v28 = vpack.c.bf16 %v60_v26, %v60_v26  ;;  %v52_v29 = vmul.f32 %v77_v21, %v43_v27 }
 0x138   :  { %71 = vst.msk [vmem:[%s132_s3] sm:$0xf] %vm70_vm1, %v81_v28  ;;  %v61_v30 = vadd.f32 %v78_v23, %v52_v29 }
 0x13a   :  { %v82_v31 = vpack.c.bf16 %v61_v30, %v61_v30 }
 0x13c   :  { %72 = vst.msk [vmem:[%s132_s3 + $0x4] sm:$0xf] %vm70_vm1, %v82_v31 }

// kernel: _lambda_.15
= control target key start
LH: loop header
LB: loop body
LE: loop exit
PB: predicated region body
PF: predicated region fallthrough
CT: control target
= control target key end

     0   :  { %v200_v0 = vmov 0.0   ;;  %vm201_vm0 = vmmov 0   ;;  %vm54_vm1 = vcmask 261120   ;;  %vm158_vm2 = vcmask 257024   ;;  %s269_s1 = inlined_call_operand.vmem [shape: bf16[32,32], index: 1, kind: input, shape index: {}]   ;;  %s270_s0 = inlined_call_operand.vmem [shape: bf16[16,32], index: 0, kind: input, shape index: {}]   ;;  %s271_s3 = inlined_call_operand.vmem [shape: bf16[16,32], index: 3, kind: input, shape index: {}]   ;;  %s272_s2 = inlined_call_operand.vmem [shape: f32[1,32], index: 2, kind: input, shape index: {}]   ;;  %s273_s4 = inlined_call_operand.vmem [shape: f32[1,32], index: 4, kind: input, shape index: {}]   ;;  %s274_s5 = inlined_call_operand.vmem [shape: f32[1,32], index: 5, kind: input, shape index: {}]   ;;  %s275_s6 = inlined_call_operand.vmem [shape: bf16[16,32], index: 6, kind: output, shape index: {}]  }
   0x1   :  { %183 = vmatprep.subr.bf16.mxu0 %v200_v0  ;;  %v193_v1 = vld [vmem:[%s269_s1 + $0x8] sm:$0xff]   ;;  %187 = vmatprep.mubr.msk.bf16.mxu0 %vm201_vm0, %v200_v0  ;;  %v194_v2 = vld [vmem:[%s269_s1] sm:$0xff]  }
   0x2   :  { %184 = vmatpush3.bf16.msra.mxu0 %v193_v1  ;;  %v195_v3 = vld [vmem:[%s270_s0] sm:$0xff]  }
   0x3   :  { %185 = vmatprep.subr.bf16.mxu0 %v200_v0  ;;  %v177_v4 = vld [vmem:[%s271_s3] sm:$0xff]  }
   0x4   :  { %v165_v5 = vld [vmem:[%s272_s2] ss:$0 sm:$0xff]  ;;  %v178_v6 = vunpack.c.l.bf16 %v177_v4  ;;  %v179_v11 = vunpack.c.h.bf16 %v177_v4 }
   0x5   :  { %v170_v35 = vld [vmem:[%s273_s4] ss:$0 sm:$0xff] }
   0x6   :  { %186 = vmatpush3.bf16.msra.mxu0 %v194_v2  ;;  %v171_v37 = vld [vmem:[%s274_s5] ss:$0 sm:$0xff] }
   0x9   :  { %188 = vmatmul.mubr.msk.bf16.vlgmr.msra.gmra.mxu0 %vm54_vm1, %v195_v3 }
  0xc9   :  { %v92_v7 = vpop.f32.mrf.mxu0 }
  0xca   :  { %v93_v8 = vadd.f32 %v165_v5, %v92_v7 }
  0xcb   :  { %v189_v9 = vpop.f32.mrf.mxu0 }
  0xcc   :  { %v103_v10 = vadd.f32 %v178_v6, %v93_v8 }
  0xcd   :  { %v95_v12 = vpop.f32.mrf.mxu0 }
  0xce   :  { %v96_v13 = vadd.f32 %v165_v5, %v95_v12  ;;  %v105_v14 = vsel %vm54_vm1, %v103_v10, 0.0 }
  0xcf   :  { %106 = vadd.xlane.f32.xlu0 %v105_v14  ;;  %v190_v15 = vpop.f32.mrf.mxu0 }
  0xd0   :  { %v104_v16 = vadd.f32 %v179_v11, %v96_v13 }
  0xd2   :  { %v108_v17 = vsel %vm54_vm1, %v104_v16, 0.0 }
  0xd3   :  { %109 = vadd.xlane.f32.xlu0 %v108_v17 }
 0x158   :  { %v107_v18 = vpop.xlane.xlu0 %106 }
 0x159   :  { %v112_v19 = vmul.f32 0.03125, %v107_v18 }
 0x15b   :  { %v114_v20 = vsub.f32 %v103_v10, %v112_v19 }
 0x15c   :  { %v110_v21 = vpop.xlane.xlu0 %109 }
 0x15d   :  { %v113_v22 = vmul.f32 0.03125, %v110_v21  ;;  %v116_v23 = vmul.f32 %v114_v20, %v114_v20 }
 0x15f   :  { %v115_v24 = vsub.f32 %v104_v16, %v113_v22  ;;  %v118_v25 = vsel %vm54_vm1, %v116_v23, 0.0 }
 0x160   :  { %119 = vadd.xlane.f32.xlu1 %v118_v25 }
 0x161   :  { %v117_v26 = vmul.f32 %v115_v24, %v115_v24 }
 0x163   :  { %v121_v27 = vsel %vm54_vm1, %v117_v26, 0.0 }
 0x164   :  { %122 = vadd.xlane.f32.xlu1 %v121_v27 }
 0x1e9   :  { %v120_v28 = vpop.xlane.xlu1 %119 }
 0x1ea   :  { %v124_v29 = vmul.f32 0.03125, %v120_v28 }
 0x1ec   :  { %v126_v30 = vadd.f32 1e-12, %v124_v29 }
 0x1ed   :  { %v123_v31 = vpop.xlane.xlu1 %122 }
 0x1ee   :  { %196 = vrsqrt.f32 %v126_v30  ;;  %v125_v32 = vmul.f32 0.03125, %v123_v31 }
 0x1f0   :  { %v127_v33 = vadd.f32 1e-12, %v125_v32 }
 0x1f2   :  { %198 = vrsqrt.f32 %v127_v33 }
 0x1fb   :  { %v197_v34 = vpop.eup %196 }
 0x1fc   :  { %v130_v36 = vmul.f32 %v197_v34, %v114_v20 }
 0x1fe   :  { %v139_v38 = vmul.f32 %v170_v35, %v130_v36 }
 0x1ff   :  { %v199_v39 = vpop.eup %198 }
 0x200   :  { %v148_v40 = vadd.f32 %v171_v37, %v139_v38  ;;  %v131_v41 = vmul.f32 %v199_v39, %v115_v24 }
 0x202   :  { %v174_v42 = vpack.c.bf16 %v148_v40, %v148_v40  ;;  %v140_v43 = vmul.f32 %v170_v35, %v131_v41 }
 0x204   :  { %159 = vst.msk [vmem:[%s275_s6] sm:$0xf] %vm158_vm2, %v174_v42  ;;  %v149_v44 = vadd.f32 %v171_v37, %v140_v43 }
 0x206   :  { %v175_v45 = vpack.c.bf16 %v149_v44, %v149_v44 }
 0x208   :  { %160 = vst.msk [vmem:[%s275_s6 + $0x4] sm:$0xf] %vm158_vm2, %v175_v45 }

// kernel: _lambda_.13
= control target key start
LH: loop header
LB: loop body
LE: loop exit
PB: predicated region body
PF: predicated region fallthrough
CT: control target
= control target key end

     0   :  { %v130_v0 = vmov 0.0   ;;  %vm131_vm0 = vmmov 0   ;;  %vm45_vm1 = vcmask 261120   ;;  %vm98_vm2 = vcmask 781312   ;;  %s170_s1 = inlined_call_operand.vmem [shape: bf16[32,96], index: 1, kind: input, shape index: {}]   ;;  %s171_s0 = inlined_call_operand.vmem [shape: bf16[16,32], index: 0, kind: input, shape index: {}]   ;;  %s172_s2 = inlined_call_operand.vmem [shape: f32[1,96], index: 2, kind: input, shape index: {}]   ;;  %s173_s3 = inlined_call_operand.vmem [shape: bf16[16,96], index: 3, kind: output, shape index: {}]  }
   0x1   :  { %117 = vmatprep.subr.bf16.mxu0 %v130_v0  ;;  %v127_v1 = vld [vmem:[%s170_s1 + $0x8] sm:$0xff]   ;;  %121 = vmatprep.mubr.msk.bf16.mxu0 %vm131_vm0, %v130_v0  ;;  %v128_v2 = vld [vmem:[%s170_s1] sm:$0xff]  }
   0x2   :  { %118 = vmatpush3.bf16.msra.mxu0 %v127_v1  ;;  %v129_v3 = vld [vmem:[%s171_s0] sm:$0xff]  }
   0x3   :  { %119 = vmatprep.subr.bf16.mxu0 %v130_v0  ;;  %v105_v4 = vld [vmem:[%s172_s2] ss:$0 sm:$0xff] }
   0x6   :  { %120 = vmatpush3.bf16.msra.mxu0 %v128_v2 }
   0x9   :  { %122 = vmatmul.mubr.msk.bf16.vlgmr.msra.gmra.mxu0 %vm45_vm1, %v129_v3 }
  0xc9   :  { %v83_v5 = vpop.f32.mrf.mxu0 }
  0xca   :  { %v84_v6 = vadd.f32 %v105_v4, %v83_v5 }
  0xcb   :  { %v123_v7 = vpop.f32.mrf.mxu0 }
  0xcc   :  { %v112_v8 = vpack.c.bf16 %v84_v6, %v84_v6 }
  0xcd   :  { %v86_v9 = vpop.f32.mrf.mxu0 }
  0xce   :  { %99 = vst.msk [vmem:[%s173_s3] sm:$0xf] %vm98_vm2, %v112_v8  ;;  %v87_v10 = vadd.f32 %v105_v4, %v86_v9 }
  0xcf   :  { %v124_v11 = vpop.f32.mrf.mxu0 }
  0xd0   :  { %v113_v12 = vpack.c.bf16 %v87_v10, %v87_v10 }
  0xd2   :  { %100 = vst.msk [vmem:[%s173_s3 + $0x4] sm:$0xf] %vm98_vm2, %v113_v12 }

// kernel: _lambda_.14
= control target key start
LH: loop header
LB: loop body
LE: loop exit
PB: predicated region body
PF: predicated region fallthrough
CT: control target
= control target key end

     0   :  { %s1054_s15 = smov 0   ;;  %s1056_s16 = smov 0   ;;  %s1166_s0 = inlined_call_operand.vmem [shape: bf16[16,96], index: 0, kind: input, shape index: {}, may-alias: {0,1,2}]   ;;  %s1167_s1 = inlined_call_operand.vmem [shape: bf16[16,96], index: 1, kind: input, shape index: {}, may-alias: {0,1,2}]   ;;  %s1168_s2 = inlined_call_operand.vmem [shape: bf16[16,96], index: 2, kind: input, shape index: {}, may-alias: {0,1,2}]   ;;  %s1169_s3 = inlined_call_operand.vmem [shape: f32[2,1,8], index: 3, kind: input, shape index: {}]   ;;  %s1170_s4 = inlined_call_operand.vmem [shape: bf16[16,32], index: 4, kind: output, shape index: {}]  }
   0x1   :  { %s1058_s17 = smov 0  }
   0x2 LB: > { %s26_s18 = sadd.s32 1, %s1007_s16  ;;  %p847_p0 = scmp.ge.s32.totalorder %s1011_s17, 1  ;;  %s1011_s17 = sphi %s1058_s17, %s14_s17   ;;  %s1007_s16 = sphi %s1056_s16, %s1172_s16   ;;  %s1003_s15 = sphi %s1054_s15, %s1171_s15  }
   0x3   : > { %p28_p1 = scmp.ge.s32.totalorder %s26_s18, 2  ;;  %p205_p2 = scmp.lt.s32.totalorder %s1011_s17, 3 }
   0x5   : > { %s1174_s18 = smov (%p28_p1, %s26_s18), 0  ;;  %p206_p3 = pnand %p847_p0, %p205_p2 }
   0x6   : > { %p243_p4 = scmp.lt.s32.totalorder (!%p206_p3), %s1003_s15, 1  ;;  %s1015_s23 = smov (!%p206_p3), 96  }
   0x7   : > { %209 = sbr.rel (%p206_p3) target bundleno = 1538 (0x602), region = 36  ;;  %s1016_s30 = smov (!%p206_p3), 64  }
   0x8   : > { %s1017_s5 = smov (!%p206_p3), 88   ;;  %s1018_s9 = smov (!%p206_p3), 72  }
   0x9   : > { %s1019_s10 = smov (!%p206_p3), 120   ;;  %s1020_s11 = smov (!%p206_p3), 80  }
   0xa   : > { %s1021_s12 = smov (!%p206_p3), 112   ;;  %s1022_s13 = smov (!%p206_p3), 104  }
   0xb   : > { %s1023_s14 = smov (!%p206_p3), 56   ;;  %s1025_s20 = smov (!%p206_p3), 40  }
   0xc   : > { %v1013_v0 = vmov 0.0   ;;  %vm1014_vm0 = vmmov 0   ;;  %s1176_s15 = smov (!%p243_p4, %s1003_s15), 1  ;;  %vm281_vm1 = vcmask 64512   ;;  %vm348_vm2 = vcmask 1043456   ;;  %s1026_s21 = smov 8  }
   0xd   : > { %882 = vmatprep.subr.bf16.mxu0 %v1013_v0  ;;  %884 = vmatprep.mubr.msk.bf16.mxu0 %vm1014_vm0, %v1013_v0  ;;  %s1078_s19 = sshll.u32 %s1176_s15, 2  ;;  %s258_s8 = scalar_lea.vmem %s1169_s3, %s1176_s15  ;;  %vm738_vm3 = vcmask 130048   ;;  %vm740_vm4 = vcmask 195584   ;;  %vm743_vm5 = vcmask 257024  }
   0xe   : > { %888 = vmatprep.subr.bf16.mxu1 %v1013_v0  ;;  %890 = vmatprep.mubr.msk.bf16.mxu1 %vm1014_vm0, %v1013_v0  ;;  %s251_s22 = scalar_lea.vmem %s1167_s1, %s1078_s19  ;;  %s246_s26 = scalar_lea.vmem %s1166_s0, %s1078_s19  ;;  %v1103_v6 = vld [vmem:[%s258_s8] ss:$0 sm:$0xff] }
   0xf   : > { %v970_v1 = vld [vmem:[%s251_s22] ss:$0 sps:$4 sm:$0xff]   ;;  %s255_s29 = scalar_lea.vmem %s1168_s2, %s1078_s19  ;;  %s1024_s15 = smov 48  }
  0x10   : > { %279 = vrot.lane.b32.xlu0 %v970_v1, %s1015_s23  ;;  %v267_v4 = vld [vmem:[%s246_s26] sm:$0xf]  ;;  %s1027_s22 = smov 16   ;;  %s1028_s23 = smov 24  }
  0x11   : > { %v1097_v5 = vld [vmem:[%s255_s29] ss:$0 sps:$4 sm:$0xff]   ;;  %v857_v20 = vcombine.low %v267_v4, %v267_v4  ;;  %s263_s26 = scalar_lea.vmem %s1170_s4, %s1078_s19 }
  0x12   : > { %343 = vrot.lane.b32.xlu1 %v1097_v5, %s1016_s30 }
  0x16   : > { %397 = vrot.lane.b32.xlu1 %v970_v1, %s1017_s5 }
  0x82   : > { %v280_v2 = vpop.permute.xlu0 %279 }
  0x83   : > { %v286_v3 = vsel %vm281_vm1, %v280_v2, 0 }
  0x84   : > { %883 = vmatpush3.bf16.xpose.msra.mxu0 %v286_v3  ;;  %v344_v13 = vpop.permute.xlu1 %343 }
  0x85   : > { %900 = vmatprep.subr.bf16.mxu0 %v1013_v0  ;;  %v350_v14 = vsel %vm348_vm2, %v344_v13, 0 }
  0x86   : > { %889 = vmatpush3.bf16.msra.mxu1 %v350_v14 }
  0x87   : > { %894 = vmatprep.subr.bf16.mxu1 %v1013_v0 }
  0x88   : > { %v398_v21 = vpop.permute.xlu1 %397 }
  0x89   : > { %v403_v27 = vsel %vm281_vm1, %v398_v21, 0 }
  0x8b   : > { %885 = vmatmul.mubr.msk.bf16.vlgmr.msra.gmra.mxu0 %vm281_vm1, %v267_v4 }
  0x8c   : > { %902 = vmatprep.mubr.msk.bf16.mxu0 %vm1014_vm0, %v1013_v0 }
 0x14b   : > { %v322_v7 = vpop.f32.mrf.mxu0 }
 0x14c   : > { %v323_v8 = vadd.f32 %v1103_v6, %v322_v7 }
 0x14d   : > { %v886_v9 = vpop.f32.mrf.mxu0 }
 0x14e   : > { %v328_v10 = vsel %vm281_vm1, %v323_v8, -inf }
 0x14f   : > { %329 = vmax.xlane.f32.xlu0 %v328_v10  ;;  %v325_v11 = vpop.f32.mrf.mxu0 }
 0x151   : > { %v887_v12 = vpop.f32.mrf.mxu0 }
 0x165   : > { %617 = vrot.lane.b32.xlu0 %v970_v1, %s1018_s9 }
 0x1d8   : > { %v330_v15 = vpop.xlane.xlu0 %329 }
 0x1d9   : > { %v331_v16 = vsub.f32 %v323_v8, %v330_v15 }
 0x1db   : > { %v332_v17 = vmul.f32 1.442695, %v331_v16 }
 0x1dc   : > { %v618_v30 = vpop.permute.xlu0 %617 }
 0x1dd   : > { %973 = vpow2.f32 %v332_v17  ;;  %v623_v32 = vsel %vm281_vm1, %v618_v30, 0 }
 0x1ea   : > { %v974_v18 = vpop.eup %973 }
 0x1eb   : > { %v334_v19 = vsel %vm281_vm1, %v974_v18, 0.0 }
 0x1ec   : > { %335 = vadd.xlane.f32.xlu1 %v334_v19 }
 0x1fd   : > { %395 = vrot.lane.b32.xlu1 %v857_v20, %s1019_s10 }
 0x201   : > { %507 = vrot.lane.b32.xlu1 %v970_v1, %s1020_s11 }
 0x205   : > { %505 = vrot.lane.b32.xlu1 %v857_v20, %s1021_s12 }
 0x209   : > { %615 = vrot.lane.b32.xlu1 %v857_v20, %s1022_s13 }
 0x275   : > { %v336_v22 = vpop.xlane.xlu1 %335 }
 0x276   : > { %975 = vrcp.f32 %v336_v22 }
 0x279   : > { %v396_v25 = vpop.permute.xlu1 %395 }
 0x27d   : > { %v508_v28 = vpop.permute.xlu1 %507 }
 0x27e   : > { %v513_v29 = vsel %vm281_vm1, %v508_v28, 0 }
 0x281   : > { %v506_v31 = vpop.permute.xlu1 %505 }
 0x283   : > { %v976_v23 = vpop.eup %975 }
 0x284   : > { %v338_v24 = vmul.f32 %v976_v23, %v974_v18 }
 0x285   : > { %v616_v33 = vpop.permute.xlu1 %615 }
 0x286   : > { %v339_v26 = vpack.c.bf16 %v338_v24, %v338_v24 }
 0x288   : > { %891 = vmatmul.mubr.msk.bf16.vlgmr.msra.gmra.mxu1 %vm281_vm1, %v339_v26 }
 0x289   : > { %895 = vmatpush3.bf16.xpose.msra.mxu1 %v403_v27  ;;  %896 = vmatprep.mubr.msk.bf16.mxu1 %vm1014_vm0, %v1013_v0 }
 0x28a   : > { %906 = vmatprep.subr.bf16.mxu1 %v1013_v0 }
 0x290   : > { %897 = vmatmul.mubr.msk.bf16.vlgmr.msra.gmra.mxu1 %vm281_vm1, %v396_v25 }
 0x291   : > { %907 = vmatpush3.bf16.xpose.msra.mxu1 %v513_v29  ;;  %908 = vmatprep.mubr.msk.bf16.mxu1 %vm1014_vm0, %v1013_v0 }
 0x292   : > { %918 = vmatprep.subr.bf16.mxu1 %v1013_v0 }
 0x298   : > { %909 = vmatmul.mubr.msk.bf16.vlgmr.msra.gmra.mxu1 %vm281_vm1, %v506_v31 }
 0x299   : > { %919 = vmatpush3.bf16.xpose.msra.mxu1 %v623_v32  ;;  %920 = vmatprep.mubr.msk.bf16.mxu1 %vm1014_vm0, %v1013_v0 }
 0x2a0   : > { %921 = vmatmul.mubr.msk.bf16.vlgmr.msra.gmra.mxu1 %vm281_vm1, %v616_v33 }
 0x348   : > { %v1125_v34 = vpop.f32.mrf.mxu1 }
 0x34a   : > { %v892_v35 = vpop.f32.mrf.mxu1 }
 0x34c   : > { %v389_v36 = vpop.f32.mrf.mxu1 }
 0x34e   : > { %v893_v37 = vpop.f32.mrf.mxu1 }
 0x350   : > { %v439_v38 = vpop.f32.mrf.mxu1 }
 0x351   : > { %v440_v39 = vadd.f32 %v1103_v6, %v439_v38 }
 0x352   : > { %v898_v40 = vpop.f32.mrf.mxu1 }
 0x353   : > { %v445_v41 = vsel %vm281_vm1, %v440_v39, -inf }
 0x354   : > { %446 = vmax.xlane.f32.xlu1 %v445_v41  ;;  %v442_v42 = vpop.f32.mrf.mxu1 }
 0x356   : > { %v899_v43 = vpop.f32.mrf.mxu1 }
 0x358   : > { %v549_v44 = vpop.f32.mrf.mxu1 }
 0x359   : > { %v550_v45 = vadd.f32 %v1103_v6, %v549_v44 }
 0x35a   : > { %v910_v46 = vpop.f32.mrf.mxu1 }
 0x35b   : > { %v555_v47 = vsel %vm281_vm1, %v550_v45, -inf }
 0x35c   : > { %556 = vmax.xlane.f32.xlu0 %v555_v47  ;;  %v552_v48 = vpop.f32.mrf.mxu1 }
 0x35e   : > { %v911_v49 = vpop.f32.mrf.mxu1 }
 0x360   : > { %v659_v50 = vpop.f32.mrf.mxu1 }
 0x361   : > { %v660_v51 = vadd.f32 %v1103_v6, %v659_v50 }
 0x362   : > { %v922_v52 = vpop.f32.mrf.mxu1 }
 0x363   : > { %v665_v53 = vsel %vm281_vm1, %v660_v51, -inf }
 0x364   : > { %666 = vmax.xlane.f32.xlu1 %v665_v53  ;;  %v662_v54 = vpop.f32.mrf.mxu1 }
 0x366   : > { %v923_v55 = vpop.f32.mrf.mxu1 }
 0x3dd   : > { %v447_v56 = vpop.xlane.xlu1 %446 }
 0x3de   : > { %v448_v57 = vsub.f32 %v440_v39, %v447_v56 }
 0x3e0   : > { %v449_v58 = vmul.f32 1.442695, %v448_v57 }
 0x3e2   : > { %977 = vpow2.f32 %v449_v58 }
 0x3e5   : > { %v557_v3 = vpop.xlane.xlu0 %556 }
 0x3e6   : > { %v558_v4 = vsub.f32 %v550_v45, %v557_v3 }
 0x3e8   : > { %v559_v6 = vmul.f32 1.442695, %v558_v4 }
 0x3ed   : > { %v667_v59 = vpop.xlane.xlu1 %666 }
 0x3ee   : > { %v668_v60 = vsub.f32 %v660_v51, %v667_v59 }
 0x3ef   : > { %v978_v61 = vpop.eup %977 }
 0x3f0   : > { %v669_v62 = vmul.f32 1.442695, %v668_v60  ;;  %v451_v63 = vsel %vm281_vm1, %v978_v61, 0.0 }
 0x3f1   : > { %452 = vadd.xlane.f32.xlu1 %v451_v63 }
 0x3f2   : > { %979 = vpow2.f32 %v669_v62 }
 0x3f3   : > { %981 = vpow2.f32 %v559_v6 }
 0x3ff   : > { %v980_v1 = vpop.eup %979 }
 0x400   : > { %v671_v2 = vsel %vm281_vm1, %v980_v1, 0.0  ;;  %v982_v7 = vpop.eup %981 }
 0x401   : > { %672 = vadd.xlane.f32.xlu0 %v671_v2  ;;  %v561_v8 = vsel %vm281_vm1, %v982_v7, 0.0 }
 0x402   : > { %457 = vrot.lane.b32.xlu1 %v1097_v5, %s1023_s14 }
 0x417   : > { %567 = vrot.lane.b32.xlu0 %v1097_v5, %s1024_s15 }
 0x426   : > { %562 = vadd.xlane.f32.xlu1 %v561_v8 }
 0x437   : > { %677 = vrot.lane.b32.xlu1 %v1097_v5, %s1025_s20 }
 0x47a   : > { %v453_v9 = vpop.xlane.xlu1 %452 }
 0x47b   : > { %983 = vrcp.f32 %v453_v9 }
 0x47e   : > { %v458_v10 = vpop.permute.xlu1 %457 }
 0x47f   : > { %v463_v11 = vsel %vm348_vm2, %v458_v10, 0 }
 0x480   : > { %901 = vmatpush3.bf16.msra.mxu0 %v463_v11 }
 0x481   : > { %912 = vmatprep.subr.bf16.mxu0 %v1013_v0 }
 0x488   : > { %v984_v12 = vpop.eup %983 }
 0x489   : > { %v455_v13 = vmul.f32 %v984_v12, %v978_v61 }
 0x48a   : > { %v673_v14 = vpop.xlane.xlu0 %672 }
 0x48b   : > { %v456_v15 = vpack.c.bf16 %v455_v13, %v455_v13 }
 0x48d   : > { %903 = vmatmul.mubr.msk.bf16.vlgmr.msra.gmra.mxu0 %vm281_vm1, %v456_v15 }
 0x48e   : > { %v568_v16 = vpop.permute.xlu0 %567  ;;  %914 = vmatprep.mubr.msk.bf16.mxu0 %vm1014_vm0, %v1013_v0 }
 0x48f   : > { %v573_v5 = vsel %vm348_vm2, %v568_v16, 0 }
 0x490   : > { %913 = vmatpush3.bf16.msra.mxu0 %v573_v5 }
 0x491   : > { %924 = vmatprep.subr.bf16.mxu0 %v1013_v0 }
 0x4af   : > { %v563_v17 = vpop.xlane.xlu1 %562 }
 0x4b0   : > { %985 = vrcp.f32 %v563_v17 }
 0x4b1   : > { %987 = vrcp.f32 %v673_v14 }
 0x4b3   : > { %v678_v19 = vpop.permute.xlu1 %677 }
 0x4b4   : > { %v683_v21 = vsel %vm348_vm2, %v678_v19, 0 }
 0x4bd   : > { %v986_v18 = vpop.eup %985 }
 0x4be   : > { %v565_v20 = vmul.f32 %v986_v18, %v982_v7  ;;  %v988_v23 = vpop.eup %987 }
 0x4bf   : > { %v675_v24 = vmul.f32 %v988_v23, %v980_v1 }
 0x4c0   : > { %v566_v22 = vpack.c.bf16 %v565_v20, %v565_v20 }
 0x4c1   : > { %v676_v25 = vpack.c.bf16 %v675_v24, %v675_v24 }
 0x4c2   : > { %915 = vmatmul.mubr.msk.bf16.vlgmr.msra.gmra.mxu0 %vm281_vm1, %v566_v22 }
 0x4c3   : > { %925 = vmatpush3.bf16.msra.mxu0 %v683_v21  ;;  %926 = vmatprep.mubr.msk.bf16.mxu0 %vm1014_vm0, %v1013_v0 }
 0x4ca   : > { %927 = vmatmul.mubr.msk.bf16.vlgmr.msra.gmra.mxu0 %vm281_vm1, %v676_v25 }
 0x54d   : > { %v499_v26 = vpop.f32.mrf.mxu0 }
 0x54e   : > { %726 = vrot.lane.b32.xlu1 %v499_v26, %s1026_s21 }
 0x54f   : > { %v904_v27 = vpop.f32.mrf.mxu0 }
 0x551   : > { %v502_v28 = vpop.f32.mrf.mxu0 }
 0x553   : > { %v905_v29 = vpop.f32.mrf.mxu0 }
 0x582   : > { %v609_v30 = vpop.f32.mrf.mxu0 }
 0x583   : > { %730 = vrot.lane.b32.xlu0 %v609_v30, %s1027_s22 }
 0x584   : > { %v916_v31 = vpop.f32.mrf.mxu0 }
 0x586   : > { %v612_v32 = vpop.f32.mrf.mxu0 }
 0x588   : > { %v917_v33 = vpop.f32.mrf.mxu0 }
 0x58a   : > { %v719_v35 = vpop.f32.mrf.mxu0 }
 0x58b   : > { %734 = vrot.lane.b32.xlu1 %v719_v35, %s1028_s23 }
 0x58c   : > { %v928_v0 = vpop.f32.mrf.mxu0 }
 0x58e   : > { %v722_v36 = vpop.f32.mrf.mxu0 }
 0x590   : > { %v929_v37 = vpop.f32.mrf.mxu0 }
 0x5c0   : > { %v727_v38 = vpop.permute.xlu1 %726 }
 0x5c1   : > { %v737_v40 = vsel %vm281_vm1, %v1125_v34, %v727_v38 }
 0x5f5   : > { %v731_v39 = vpop.permute.xlu0 %730 }
 0x5f6   : > { %v739_v41 = vsel %vm738_vm3, %v737_v40, %v731_v39 }
 0x5fd   : > { %v735_v42 = vpop.permute.xlu1 %734 }
 0x5fe   : > { %v741_v43 = vsel %vm740_vm4, %v739_v41, %v735_v42 }
 0x5ff   : > { %v742_v44 = vpack.c.bf16 %v741_v43, %v741_v43 }
 0x601   : > { %744 = vst.msk [vmem:[%s263_s26] sm:$0xf] %vm743_vm5, %v742_v44 }
 0x602 PF: > { %s14_s17 = sadd.s32 1, %s1011_s17   ;;  %s1171_s15 = smov %s1007_s16 }
 0x603   : > { %p11_p5 = scmp.ge.s32.totalorder %s14_s17, 4   ;;  %s1172_s16 = smov %s1174_s18 }
 0x605   :  { %13 = sbr.rel (!%p11_p5) target bundleno = 2 (0x2), region = 75 }

// kernel: _lambda_.16
= control target key start
LH: loop header
LB: loop body
LE: loop exit
PB: predicated region body
PF: predicated region fallthrough
CT: control target
= control target key end

     0   :  { %v144_v0 = vmov 0.0   ;;  %vm145_vm0 = vmmov 0   ;;  %vm45_vm1 = vcmask 261120   ;;  %vm108_vm2 = vcmask 519168   ;;  %s184_s1 = inlined_call_operand.vmem [shape: bf16[32,64], index: 1, kind: input, shape index: {}]   ;;  %s185_s0 = inlined_call_operand.vmem [shape: bf16[16,32], index: 0, kind: input, shape index: {}]   ;;  %s186_s2 = inlined_call_operand.vmem [shape: f32[1,64], index: 2, kind: input, shape index: {}]   ;;  %s187_s3 = inlined_call_operand.vmem [shape: bf16[16,64], index: 3, kind: output, shape index: {}]  }
   0x1   :  { %127 = vmatprep.subr.bf16.mxu0 %v144_v0  ;;  %v137_v1 = vld [vmem:[%s184_s1 + $0x8] sm:$0xff]   ;;  %131 = vmatprep.mubr.msk.bf16.mxu0 %vm145_vm0, %v144_v0  ;;  %v138_v2 = vld [vmem:[%s184_s1] sm:$0xff]  }
   0x2   :  { %128 = vmatpush3.bf16.msra.mxu0 %v137_v1  ;;  %v139_v3 = vld [vmem:[%s185_s0] sm:$0xff]  }
   0x3   :  { %129 = vmatprep.subr.bf16.mxu0 %v144_v0  ;;  %v115_v4 = vld [vmem:[%s186_s2] ss:$0 sm:$0xff] }
   0x6   :  { %130 = vmatpush3.bf16.msra.mxu0 %v138_v2 }
   0x9   :  { %132 = vmatmul.mubr.msk.bf16.vlgmr.msra.gmra.mxu0 %vm45_vm1, %v139_v3 }
  0xc9   :  { %v83_v5 = vpop.f32.mrf.mxu0 }
  0xca   :  { %v84_v6 = vadd.f32 %v115_v4, %v83_v5 }
  0xcb   :  { %v133_v7 = vpop.f32.mrf.mxu0 }
  0xcc   :  { %v92_v8 = vmul.f32 0.70710677, %v84_v6  ;;  %v90_v14 = vmul.f32 0.5, %v84_v6 }
  0xcd   :  { %v86_v9 = vpop.f32.mrf.mxu0 }
  0xce   :  { %140 = verf.f32 %v92_v8  ;;  %v87_v10 = vadd.f32 %v115_v4, %v86_v9 }
  0xcf   :  { %v134_v11 = vpop.f32.mrf.mxu0 }
  0xd0   :  { %v93_v12 = vmul.f32 0.70710677, %v87_v10  ;;  %v91_v19 = vmul.f32 0.5, %v87_v10 }
  0xd2   :  { %142 = verf.f32 %v93_v12 }
  0xdb   :  { %v141_v13 = vpop.eup %140 }
  0xdc   :  { %v96_v15 = vadd.f32 1.0, %v141_v13 }
  0xde   :  { %v98_v16 = vmul.f32 %v96_v15, %v90_v14 }
  0xdf   :  { %v143_v17 = vpop.eup %142 }
  0xe0   :  { %v122_v18 = vpack.c.bf16 %v98_v16, %v98_v16  ;;  %v97_v20 = vadd.f32 1.0, %v143_v17 }
  0xe2   :  { %109 = vst.msk [vmem:[%s187_s3] sm:$0xf] %vm108_vm2, %v122_v18  ;;  %v99_v21 = vmul.f32 %v97_v20, %v91_v19 }
  0xe4   :  { %v123_v22 = vpack.c.bf16 %v99_v21, %v99_v21 }
  0xe6   :  { %110 = vst.msk [vmem:[%s187_s3 + $0x4] sm:$0xf] %vm108_vm2, %v123_v22 }

// kernel: _lambda_.17
= control target key start
LH: loop header
LB: loop body
LE: loop exit
PB: predicated region body
PF: predicated region fallthrough
CT: control target
= control target key end

     0   :  { %v227_v0 = vmov 0.0   ;;  %vm228_vm0 = vmmov 0   ;;  %vm70_vm1 = vcmask 523264   ;;  %vm121_vm2 = vcmask 261120   ;;  %s301_s1 = inlined_call_operand.vmem [shape: bf16[64,32], index: 1, kind: input, shape index: {}]   ;;  %s302_s0 = inlined_call_operand.vmem [shape: bf16[16,64], index: 0, kind: input, shape index: {}]   ;;  %s303_s3 = inlined_call_operand.vmem [shape: bf16[16,32], index: 3, kind: input, shape index: {}]   ;;  %s304_s2 = inlined_call_operand.vmem [shape: f32[1,32], index: 2, kind: input, shape index: {}]   ;;  %s305_s4 = inlined_call_operand.vmem [shape: f32[1,32], index: 4, kind: input, shape index: {}]   ;;  %s306_s5 = inlined_call_operand.vmem [shape: f32[1,32], index: 5, kind: input, shape index: {}]   ;;  %s307_s6 = inlined_call_operand.vmem [shape: bf16[16,32], index: 6, kind: output, shape index: {}]  }
   0x1   :  { %204 = vmatprep.subr.bf16.mxu0 %v227_v0  ;;  %v218_v1 = vld [vmem:[%s301_s1 + $0x18] sm:$0xff]   ;;  %212 = vmatprep.mubr.msk.bf16.mxu0 %vm228_vm0, %v227_v0  ;;  %v219_v2 = vld [vmem:[%s301_s1 + $0x10] sm:$0xff]   ;;  %v220_v3 = vld [vmem:[%s301_s1 + $0x8] sm:$0xff]   ;;  %vm175_vm3 = vcmask 257024  }
   0x2   :  { %205 = vmatpush3.bf16.msra.mxu0 %v218_v1  ;;  %v221_v4 = vld [vmem:[%s301_s1] sm:$0xff]  }
   0x3   :  { %206 = vmatprep.subr.bf16.mxu0 %v227_v0  ;;  %v222_v5 = vld [vmem:[%s302_s0] sm:$0xff]  }
   0x4   :  { %v196_v6 = vld [vmem:[%s303_s3] sm:$0xff]  }
   0x5   :  { %v182_v7 = vld [vmem:[%s304_s2] ss:$0 sm:$0xff]  ;;  %v197_v8 = vunpack.c.l.bf16 %v196_v6  ;;  %v198_v13 = vunpack.c.h.bf16 %v196_v6 }
   0x6   :  { %207 = vmatpush3.bf16.msra.mxu0 %v219_v2  ;;  %v189_v37 = vld [vmem:[%s305_s4] ss:$0 sm:$0xff] }
   0x7   :  { %208 = vmatprep.subr.bf16.mxu0 %v227_v0  ;;  %v190_v39 = vld [vmem:[%s306_s5] ss:$0 sm:$0xff] }
   0xa   :  { %209 = vmatpush3.bf16.msra.mxu0 %v220_v3 }
   0xb   :  { %210 = vmatprep.subr.bf16.mxu0 %v227_v0 }
   0xe   :  { %211 = vmatpush3.bf16.msra.mxu0 %v221_v4 }
  0x11   :  { %213 = vmatmul.mubr.msk.bf16.vlgmr.msra.gmra.mxu0 %vm70_vm1, %v222_v5 }
  0xd1   :  { %v108_v9 = vpop.f32.mrf.mxu0 }
  0xd2   :  { %v109_v10 = vadd.f32 %v182_v7, %v108_v9 }
  0xd3   :  { %v214_v11 = vpop.f32.mrf.mxu0 }
  0xd4   :  { %v119_v12 = vadd.f32 %v197_v8, %v109_v10 }
  0xd5   :  { %v111_v14 = vpop.f32.mrf.mxu0 }
  0xd6   :  { %v112_v15 = vadd.f32 %v182_v7, %v111_v14  ;;  %v122_v16 = vsel %vm121_vm2, %v119_v12, 0.0 }
  0xd7   :  { %123 = vadd.xlane.f32.xlu0 %v122_v16  ;;  %v215_v17 = vpop.f32.mrf.mxu0 }
  0xd8   :  { %v120_v18 = vadd.f32 %v198_v13, %v112_v15 }
  0xda   :  { %v125_v19 = vsel %vm121_vm2, %v120_v18, 0.0 }
  0xdb   :  { %126 = vadd.xlane.f32.xlu0 %v125_v19 }
 0x160   :  { %v124_v20 = vpop.xlane.xlu0 %123 }
 0x161   :  { %v129_v21 = vmul.f32 0.03125, %v124_v20 }
 0x163   :  { %v131_v22 = vsub.f32 %v119_v12, %v129_v21 }
 0x164   :  { %v127_v23 = vpop.xlane.xlu0 %126 }
 0x165   :  { %v130_v24 = vmul.f32 0.03125, %v127_v23  ;;  %v133_v25 = vmul.f32 %v131_v22, %v131_v22 }
 0x167   :  { %v132_v26 = vsub.f32 %v120_v18, %v130_v24  ;;  %v135_v27 = vsel %vm121_vm2, %v133_v25, 0.0 }
 0x168   :  { %136 = vadd.xlane.f32.xlu1 %v135_v27 }
 0x169   :  { %v134_v28 = vmul.f32 %v132_v26, %v132_v26 }
 0x16b   :  { %v138_v29 = vsel %vm121_vm2, %v134_v28, 0.0 }
 0x16c   :  { %139 = vadd.xlane.f32.xlu1 %v138_v29 }
 0x1f1   :  { %v137_v30 = vpop.xlane.xlu1 %136 }
 0x1f2   :  { %v141_v31 = vmul.f32 0.03125, %v137_v30 }
 0x1f4   :  { %v143_v32 = vadd.f32 1e-12, %v141_v31 }
 0x1f5   :  { %v140_v33 = vpop.xlane.xlu1 %139 }
 0x1f6   :  { %223 = vrsqrt.f32 %v143_v32  ;;  %v142_v34 = vmul.f32 0.03125, %v140_v33 }
 0x1f8   :  { %v144_v35 = vadd.f32 1e-12, %v142_v34 }
 0x1fa   :  { %225 = vrsqrt.f32 %v144_v35 }
 0x203   :  { %v224_v36 = vpop.eup %223 }
 0x204   :  { %v147_v38 = vmul.f32 %v224_v36, %v131_v22 }
 0x206   :  { %v156_v40 = vmul.f32 %v189_v37, %v147_v38 }
 0x207   :  { %v226_v41 = vpop.eup %225 }
 0x208   :  { %v165_v42 = vadd.f32 %v190_v39, %v156_v40  ;;  %v148_v43 = vmul.f32 %v226_v41, %v132_v26 }
 0x20a   :  { %v193_v44 = vpack.c.bf16 %v165_v42, %v165_v42  ;;  %v157_v45 = vmul.f32 %v189_v37, %v148_v43 }
 0x20c   :  { %176 = vst.msk [vmem:[%s307_s6] sm:$0xf] %vm175_vm3, %v193_v44  ;;  %v166_v46 = vadd.f32 %v190_v39, %v157_v45 }
 0x20e   :  { %v194_v47 = vpack.c.bf16 %v166_v46, %v166_v46 }
 0x210   :  { %177 = vst.msk [vmem:[%s307_s6 + $0x4] sm:$0xf] %vm175_vm3, %v194_v47 }

// kernel: _lambda_.23
= control target key start
LH: loop header
LB: loop body
LE: loop exit
PB: predicated region body
PF: predicated region fallthrough
CT: control target
= control target key end

     0   :  { %14 = vsyncpa [#allocation3], 0  ;;  %v370_v1 = vmov 0.0   ;;  %vm371_vm0 = vmmov 0   ;;  %s461_s0 = inlined_call_operand.vmem [shape: bf16[2,32], index: 0, kind: input, shape index: {}]   ;;  %s462_s1 = inlined_call_operand.vmem [shape: bf16[32,32], index: 1, kind: input, shape index: {}]   ;;  %s463_s2 = inlined_call_operand.vmem [shape: f32[1,32], index: 2, kind: input, shape index: {}]   ;;  %s464_s3 = inlined_call_operand.vmem [shape: bf16[32,4], index: 3, kind: input, shape index: {}]   ;;  %s465_s4 = inlined_call_operand.vmem [shape: f32[1,4], index: 4, kind: input, shape index: {}]   ;;  %s466_s5 = inlined_call_operand.vmem [shape: s32[2,1], index: 5, kind: input, shape index: {}]   ;;  %s467_s6 = inlined_call_operand.hbm [shape: f32[1,1], index: 6, kind: output, shape index: {0}]   ;;  %s468_s7 = inlined_call_operand.hbm [shape: f32[2,4], index: 7, kind: output, shape index: {1}]   ;;  %s469_s8 = inlined_call_operand.hbm [shape: f32[2,4], index: 8, kind: output, shape index: {2}]  }
   0x1   :  { %v294_v0 = vld [vmem:[%s462_s1 + $0x8] sm:$0xff]   ;;  %269 = vmatprep.subr.bf16.mxu0 %v370_v1  ;;  %277 = vmatprep.subr.bf16.mxu1 %v370_v1  ;;  %v295_v2 = vld [vmem:[%s462_s1] sm:$0xff]  }
   0x2   :  { %270 = vmatpush3.bf16.msra.mxu0 %v294_v0  ;;  %273 = vmatprep.mubr.msk.bf16.mxu0 %vm371_vm0, %v370_v1 }
   0x3   :  { %271 = vmatprep.subr.bf16.mxu0 %v370_v1  ;;  %281 = vmatprep.mubr.msk.bf16.mxu1 %vm371_vm0, %v370_v1 }
   0x4   :  { %15 = vsyncpa [#allocation5], 0  ;;  %v29_v3 = vld [vmem:[%s461_s0] sm:$0x1]  ;;  %vm53_vm1 = vcmask 261120   ;;  %v296_v4 = vld [vmem:[%s464_s3 + $0x8] sm:$0xff]   ;;  %v182_v26 = vlaneseq }
   0x5   :  { %278 = vmatpush3.bf16.msra.mxu1 %v296_v4  ;;  %v297_v5 = vld [vmem:[%s464_s3] sm:$0xff]   ;;  %v372_v14 = vmov 0   ;;  %vm165_vm2 = vcmask 25600   ;;  %vm196_vm4 = vcmask 1024  }
   0x6   :  { %272 = vmatpush3.bf16.msra.mxu0 %v295_v2  ;;  %279 = vmatprep.subr.bf16.mxu1 %v370_v1  ;;  %v254_v6 = vld [vmem:[%s463_s2] ss:$0 sm:$0xff]  ;;  %v183_v27 = vand.u32 127, %v182_v26 }
   0x7   :  { %293 = vset.pattern.permute.xlu0 %v372_v14  ;;  %v258_v15 = vld [vmem:[%s465_s4] ss:$0 sm:$0xff]  ;;  %s373_s4 = smov [#allocation4]  }
   0x8   :  { %v184_v22 = vld [vmem:[%s466_s5] sm:$0x3]  ;;  %s229_s5 = sshll.u32 %s373_s4, 4  ;;  %s230_s5 = int_to_ptr.vmem [resolvable:$true] %s229_s5 }
   0x9   :  { %274 = vmatmul.mubr.msk.bf16.vlgmr.msra.gmra.mxu0 %vm53_vm1, %v29_v3  ;;  %280 = vmatpush3.bf16.msra.mxu1 %v297_v5  ;;  %s306_s17 = scalar_lea.vmem %s230_s5, 32  ;;  %p311_p1 = scmp.lt.s32.totalorder %s230_s5, %s230_s5 }
   0xa   :  { %p307_p0 = scmp.ne.s32.totalorder %s230_s5, %s306_s17  ;;  %p312_p2 = scmp.lt.s32.totalorder %s306_s17, %s306_s17 }
   0xc   :  { %p313_p3 = por %p312_p2, %p311_p1 }
   0xe   :  { %p314_p4 = pnand %p313_p3, %p307_p0 }
  0xc9   :  { %v91_v7 = vpop.f32.mrf.mxu0 }
  0xca   :  { %v92_v8 = vadd.f32 %v254_v6, %v91_v7 }
  0xcb   :  { %v275_v9 = vpop.f32.mrf.mxu0 }
  0xcc   :  { %298 = vtanh.f32 %v92_v8 }
  0xcd   :  { %v94_v10 = vpop.f32.mrf.mxu0 }
  0xcf   :  { %v276_v11 = vpop.f32.mrf.mxu0 }
  0xd9   :  { %v299_v12 = vpop.eup %298 }
  0xda   :  { %v98_v13 = vpack.c.bf16 %v299_v12, %v299_v12 }
  0xdc   :  { %282 = vmatmul.mubr.msk.bf16.vlgmr.msra.gmra.mxu1 %vm53_vm1, %v98_v13 }
 0x19c   :  { %v159_v16 = vpop.f32.mrf.mxu1 }
 0x19d   :  { %v160_v17 = vadd.f32 %v258_v15, %v159_v16 }
 0x19e   :  { %v283_v18 = vpop.f32.mrf.mxu1 }
 0x19f   :  { %v167_v19 = vsel %vm165_vm2, %v160_v17, -inf  ;;  %166 = vst.msk [vmem:[#allocation4] sm:$0x3] %vm165_vm2, %v160_v17 }
 0x1a0   :  { %168 = vmax.xlane.f32.xlu0 %v167_v19  ;;  %v162_v20 = vpop.f32.mrf.mxu1 }
 0x1a2   :  { %v284_v21 = vpop.f32.mrf.mxu1 }
 0x1b6   :  { %186 = vperm.xlu0 %293, %v184_v22  }
 0x229   :  { %v169_v23 = vpop.xlane.xlu0 %168 }
 0x22a   :  { %v170_v24 = vsub.f32 %v160_v17, %v169_v23 }
 0x22c   :  { %v171_v25 = vmul.f32 1.442695, %v170_v24 }
 0x22e   :  { %300 = vpow2.f32 %v171_v25 }
 0x231   :  { %v187_v28 = vpop.permute.xlu0 %186 }
 0x232   :  { %vm188_vm3 = vcmp.eq.s32.totalorder %v183_v27, %v187_v28 }
 0x233   :  { %v262_v29 = vsel %vm188_vm3, 1.0, %v370_v1 }
 0x234   :  { %v191_v32 = vmul.f32 %v262_v29, %v160_v17 }
 0x236   :  { %v192_v33 = vsel %vm165_vm2, %v191_v32, 0.0 }
 0x23b   :  { %v301_v30 = vpop.eup %300 }
 0x23c   :  { %v173_v31 = vsel %vm165_vm2, %v301_v30, 0.0 }
 0x23d   :  { %174 = vadd.xlane.f32.xlu1 %v173_v31 }
 0x241   :  { %193 = vadd.xlane.f32.xlu1 %v192_v33 }
 0x2c6   :  { %v175_v34 = vpop.xlane.xlu1 %174 }
 0x2c7   :  { %302 = vrcp.f32 %v175_v34 }
 0x2c8   :  { %304 = vlog2.f32 %v175_v34 }
 0x2ca   :  { %v194_v40 = vpop.xlane.xlu1 %193 }
 0x2d4   :  { %v303_v35 = vpop.eup %302 }
 0x2d5   :  { %v305_v36 = vpop.eup %304  ;;  %v177_v37 = vmul.f32 %v303_v35, %v301_v30 }
 0x2d6   :  { %v180_v38 = vmul.f32 0.6931472, %v305_v36 }
 0x2d7   :  { %178 = vst.msk [vmem:[#allocation6] sm:$0x3] %vm165_vm2, %v177_v37 }
 0x2d8   :  { %v181_v39 = vadd.f32 %v180_v38, %v169_v23 }
 0x2da   :  { %v195_v41 = vsub.f32 %v181_v39, %v194_v40 }
 0x2dc   :  { %v197_v42 = vsel %vm196_vm4, %v195_v41, 0.0 }
 0x2dd   :  { %198 = vadd.xlane.f32.xlu1 %v197_v42 }
 0x2de   :  { %317 = shalt.err (!%p314_p4)
}
 0x2df   :  { %232 = dma.vmem_to_hbm [thread:$0]  %s230_s5, 32, %s468_s7, [#allocation5]  }
 0x2e0   :  { %s374_s20 = smov [#allocation6]  }
 0x2e1   :  { %s239_s21 = sshll.u32 %s374_s20, 4  ;;  %s240_s21 = int_to_ptr.vmem [resolvable:$true] %s239_s21 }
 0x2e2   :  { %s326_s22 = scalar_lea.vmem %s240_s21, 32  ;;  %p331_p6 = scmp.lt.s32.totalorder %s240_s21, %s240_s21 }
 0x2e3   :  { %p327_p5 = scmp.ne.s32.totalorder %s240_s21, %s326_s22  ;;  %p332_p7 = scmp.lt.s32.totalorder %s326_s22, %s326_s22 }
 0x2e5   :  { %p333_p8 = por %p332_p7, %p331_p6 }
 0x2e7   :  { %p334_p9 = pnand %p333_p8, %p327_p5 }
 0x2e9   :  { %337 = shalt.err (!%p334_p9)
}
 0x2ea   :  { %242 = dma.vmem_to_hbm [thread:$0]  %s240_s21, 32, %s469_s8, [#allocation5]   ;;  %vm211_vm5 = vcmask 0  }
 0x2eb   :  { %s375_s7 = smov [#allocation2]  }
 0x2ec   :  { %s219_s25 = sshll.u32 %s375_s7, 4  ;;  %s220_s25 = int_to_ptr.vmem [resolvable:$true] %s219_s25 }
 0x2ed   :  { %s346_s28 = scalar_lea.vmem %s220_s25, 16  ;;  %s350_s29 = scalar_lea.vmem %s220_s25, 32 }
 0x2ee   :  { %p347_p10 = scmp.ne.s32.totalorder %s220_s25, %s346_s28  ;;  %p351_p11 = scmp.lt.s32.totalorder %s220_s25, %s220_s25 }
 0x2ef   :  { %p352_p12 = scmp.lt.s32.totalorder %s350_s29, %s346_s28 }
 0x2f1   :  { %p353_p13 = por %p352_p12, %p351_p11 }
 0x2f3   :  { %p354_p0 = pnand %p353_p13, %p347_p10 }
 0x366   :  { %v199_v43 = vpop.xlane.xlu1 %198 }
 0x367   :  { %v200_v44 = vrot.slane %v199_v43, 4 }
 0x369   :  { %v201_v45 = vadd.f32 %v200_v44, %v199_v43 }
 0x36b   :  { %v202_v46 = vrot.slane %v201_v45, 2 }
 0x36d   :  { %v203_v47 = vadd.f32 %v202_v46, %v201_v45 }
 0x36f   :  { %v204_v48 = vrot.slane %v203_v47, 1 }
 0x371   :  { %v205_v49 = vadd.f32 %v204_v48, %v203_v47 }
 0x373   :  { %285 = vpush %v205_v49 }
 0x3a4   :  { %s286_s26 = spop %285 }
 0x3a5   :  { %s209_s27 = smul.f32 0.5, %s286_s26 }
 0x3a7   :  { %v210_v50 = vstv %s209_s27 }
 0x3a8   :  { %212 = vst.msk [vmem:[#allocation2] sm:$0x1] %vm211_vm5, %v210_v50 }
 0x3a9   :  { %357 = shalt.err (!%p354_p0)
}
 0x3aa   :  { %222 = dma.vmem_to_hbm [thread:$0]  %s220_s25, 16, %s467_s6, [#allocation3]  }
 0x3ab   :  { %366 = dma.done.wait [#allocation3], 16  }
 0x3ac   :  { %367 = vsyncadd [#allocation3], 4294967280 }
 0x3ad   :  { %368 = dma.done.wait [#allocation5], 64  }
 0x3ae   :  { %369 = vsyncadd [#allocation5], 4294967232 }
 0x3af   :  { %252 = vsyncpa [#allocation3], 1 }
 0x3b0   :  { %253 = vsyncpa [#allocation5], 1 }

</bundles_post_ra>
